<compile_context>
chip_gen: v6e
topology: v6e:2x2x1
jax: 0.10.0
libtpu: 0.0.40
codegen_flags: <defaults>
</compile_context>

<pallas_src>
import functools
import math

import jax
import jax.numpy as jnp
from jax import lax
from jax.experimental import pallas as pl
from jax.experimental.pallas import tpu as pltpu


# Tile targets (tunable per generation: v5e is fine with 128-wide, v6e/v7x want
# >=256-wide MXU operands; these sizes keep double-buffered VMEM well under the
# v7x 64 MiB budget).
TM, TN, TK = 256, 512, 512
TQ_ATTN = 256


# ----------------------------------------------------------------------------
# Small helpers
# ----------------------------------------------------------------------------

def _round_up(x, m):
    return ((x + m - 1) // m) * m


def _pad2(x, rows, cols):
    pr, pc = rows - x.shape[0], cols - x.shape[1]
    if pr or pc:
        x = jnp.pad(x, ((0, pr), (0, pc)))
    return x


def _gelu_tanh(x):
    # nn.GELU(approximate='tanh')
    c = math.sqrt(2.0 / math.pi)
    return 0.5 * x * (1.0 + jnp.tanh(c * (x + 0.044715 * x * x * x)))


# ----------------------------------------------------------------------------
# Pallas kernels
# ----------------------------------------------------------------------------

def _matmul_kernel(*refs, activation, has_residual):
    """Tiled K-reduction matmul: out = act(x @ w + b) [+ residual]."""
    if has_residual:
        x_ref, w_ref, b_ref, r_ref, o_ref, acc_ref = refs
    else:
        x_ref, w_ref, b_ref, o_ref, acc_ref = refs
        r_ref = None

    @pl.when(pl.program_id(2) == 0)
    def _():
        acc_ref[...] = jnp.zeros_like(acc_ref)

    acc_ref[...] += jnp.dot(
        x_ref[...].astype(jnp.bfloat16),
        w_ref[...].astype(jnp.bfloat16),
        preferred_element_type=jnp.float32,
    )

    @pl.when(pl.program_id(2) == pl.num_programs(2) - 1)
    def _():
        out = acc_ref[...] + b_ref[...].astype(jnp.float32)
        if activation == "gelu":
            out = _gelu_tanh(out)
        if has_residual:
            out = out + r_ref[...].astype(jnp.float32)
        o_ref[...] = out.astype(o_ref.dtype)


def _ln_matmul_kernel(x_ref, g_ref, bln_ref, w_ref, b_ref, o_ref, *, activation):
    """Fused LayerNorm(x) @ w + b (+ GELU). x block is (tm, K_full)."""
    x = x_ref[...].astype(jnp.float32)
    mean = jnp.mean(x, axis=-1, keepdims=True)
    var = jnp.mean(jnp.square(x - mean), axis=-1, keepdims=True)
    xn = (x - mean) * lax.rsqrt(var + 1e-5)
    xn = xn * g_ref[...].astype(jnp.float32) + bln_ref[...].astype(jnp.float32)

    acc = jnp.dot(
        xn.astype(jnp.bfloat16),
        w_ref[...].astype(jnp.bfloat16),
        preferred_element_type=jnp.float32,
    )
    out = acc + b_ref[...].astype(jnp.float32)
    if activation == "gelu":
        out = _gelu_tanh(out)
    o_ref[...] = out.astype(o_ref.dtype)


def _flash_attn_kernel(q_ref, k_ref, v_ref, o_ref, m_sc, l_sc, acc_sc,
                       *, scale, tq, tk):
    """Causal flash attention for one (batch*head); online softmax over KV tiles."""
    qi = pl.program_id(1)
    ki = pl.program_id(2)

    @pl.when(ki == 0)
    def _():
        m_sc[...] = jnp.full_like(m_sc, -jnp.inf)
        l_sc[...] = jnp.zeros_like(l_sc)
        acc_sc[...] = jnp.zeros_like(acc_sc)

    # Skip KV tiles strictly above the causal diagonal.
    @pl.when(ki * tk <= qi * tq + (tq - 1))
    def _():
        q = (q_ref[0].astype(jnp.float32) * scale).astype(jnp.bfloat16)   # (tq, D)
        k = k_ref[0].astype(jnp.bfloat16)                                 # (tk, D)
        # contract over head_dim for both operands (no explicit transpose)
        s = lax.dot_general(q, k, (((1,), (1,)), ((), ())),
                            preferred_element_type=jnp.float32)           # (tq, tk)
        row = qi * tq + lax.broadcasted_iota(jnp.int32, (tq, tk), 0)
        col = ki * tk + lax.broadcasted_iota(jnp.int32, (tq, tk), 1)
        s = jnp.where(col <= row, s, -jnp.inf)

        m_prev = m_sc[...]
        m_new = jnp.maximum(m_prev, jnp.max(s, axis=-1, keepdims=True))
        alpha = jnp.exp(m_prev - m_new)
        p = jnp.exp(s - m_new)
        l_sc[...] = alpha * l_sc[...] + jnp.sum(p, axis=-1, keepdims=True)
        acc_sc[...] = alpha * acc_sc[...] + jnp.dot(
            p.astype(jnp.bfloat16), v_ref[0].astype(jnp.bfloat16),
            preferred_element_type=jnp.float32)
        m_sc[...] = m_new

    @pl.when(ki == pl.num_programs(2) - 1)
    def _():
        inv_l = pl.reciprocal(l_sc[...], approx=True)
        o_ref[0] = (acc_sc[...] * inv_l).astype(o_ref.dtype)


# ----------------------------------------------------------------------------
# pallas_call wrappers
# ----------------------------------------------------------------------------

def matmul(x2, w, b, *, activation=None, residual=None):
    """x2:(M,K) f32, w:(K,N) bf16, b:(N,) f32 -> (M,N) f32."""
    M, K = x2.shape
    N = w.shape[1]
    tm, tn, tk = min(TM, M), min(TN, N), min(TK, K)
    Mp, Np, Kp = _round_up(M, tm), _round_up(N, tn), _round_up(K, tk)

    xp = _pad2(x2, Mp, Kp)
    wp = _pad2(w, Kp, Np)
    bp = jnp.pad(b, (0, Np - N)).reshape(1, Np)

    in_specs = [
        pl.BlockSpec((tm, tk), lambda i, j, k: (i, k)),
        pl.BlockSpec((tk, tn), lambda i, j, k: (k, j)),
        pl.BlockSpec((1, tn), lambda i, j, k: (0, j)),
    ]
    args = [xp, wp, bp]
    has_residual = residual is not None
    if has_residual:
        in_specs.append(pl.BlockSpec((tm, tn), lambda i, j, k: (i, j)))
        args.append(_pad2(residual, Mp, Np))

    out = pl.pallas_call(
        functools.partial(_matmul_kernel, activation=activation,
                          has_residual=has_residual),
        grid=(Mp // tm, Np // tn, Kp // tk),
        out_shape=jax.ShapeDtypeStruct((Mp, Np), jnp.float32),
        in_specs=in_specs,
        out_specs=pl.BlockSpec((tm, tn), lambda i, j, k: (i, j)),
        scratch_shapes=[pltpu.VMEM((tm, tn), jnp.float32)],
        compiler_params=pltpu.CompilerParams(
            dimension_semantics=("parallel", "parallel", "arbitrary")),
    )(*args)
    return out[:M, :N]


def ln_matmul(x2, g, bln, w, b, *, activation=None):
    """Fused LayerNorm + linear: LN over K of x2:(M,K), then @ w:(K,N) + b."""
    M, K = x2.shape
    N = w.shape[1]
    tm, tn = min(TM, M), min(TN, N)
    Mp, Np = _round_up(M, tm), _round_up(N, tn)

    xp = _pad2(x2, Mp, K)            # K is NOT padded (LN needs the real row)
    wp = _pad2(w, K, Np)
    bp = jnp.pad(b, (0, Np - N)).reshape(1, Np)
    g2 = g.reshape(1, K)
    bl2 = bln.reshape(1, K)

    out = pl.pallas_call(
        functools.partial(_ln_matmul_kernel, activation=activation),
        grid=(Mp // tm, Np // tn),
        out_shape=jax.ShapeDtypeStruct((Mp, Np), jnp.float32),
        in_specs=[
            pl.BlockSpec((tm, K), lambda i, j: (i, 0)),
            pl.BlockSpec((1, K), lambda i, j: (0, 0)),
            pl.BlockSpec((1, K), lambda i, j: (0, 0)),
            pl.BlockSpec((K, tn), lambda i, j: (0, j)),
            pl.BlockSpec((1, tn), lambda i, j: (0, j)),
        ],
        out_specs=pl.BlockSpec((tm, tn), lambda i, j: (i, j)),
        compiler_params=pltpu.CompilerParams(
            dimension_semantics=("parallel", "parallel")),
    )(xp, g2, bl2, wp, bp)
    return out[:M, :N]


def causal_attention(q, k, v):
    """q,k,v: (B, H, T, D) f32 -> (B, H, T, D) f32, flash-style causal attention."""
    B, H, T, D = q.shape
    scale = 1.0 / math.sqrt(D)
    tile = min(TQ_ATTN, T)
    Tp = _round_up(T, tile)

    qf = q.reshape(B * H, T, D)
    kf = k.reshape(B * H, T, D)
    vf = v.reshape(B * H, T, D)
    if Tp != T:
        pad = ((0, 0), (0, Tp - T), (0, 0))
        qf, kf, vf = jnp.pad(qf, pad), jnp.pad(kf, pad), jnp.pad(vf, pad)

    nq = nk = Tp // tile
    out = pl.pallas_call(
        functools.partial(_flash_attn_kernel, scale=scale, tq=tile, tk=tile),
        grid=(B * H, nq, nk),
        out_shape=jax.ShapeDtypeStruct((B * H, Tp, D), q.dtype),
        in_specs=[
            pl.BlockSpec((1, tile, D), lambda b, qi, ki: (b, qi, 0)),
            pl.BlockSpec((1, tile, D), lambda b, qi, ki: (b, ki, 0)),
            pl.BlockSpec((1, tile, D), lambda b, qi, ki: (b, ki, 0)),
        ],
        out_specs=pl.BlockSpec((1, tile, D), lambda b, qi, ki: (b, qi, 0)),
        scratch_shapes=[
            pltpu.VMEM((tile, 1), jnp.float32),   # running max m
            pltpu.VMEM((tile, 1), jnp.float32),   # running denom l
            pltpu.VMEM((tile, D), jnp.float32),   # output accumulator
        ],
        compiler_params=pltpu.CompilerParams(
            dimension_semantics=("parallel", "parallel", "arbitrary")),
    )(qf, kf, vf)
    return out[:, :T, :].reshape(B, H, T, D)


# ----------------------------------------------------------------------------
# Parameter init (synthetic, deterministic; mirrors GPT._init_weights shapes)
# ----------------------------------------------------------------------------

def init_params(key, *, vocab_size, block_size, n_layer, n_head, n_embd):
    C = n_embd
    std = 0.02

    def normal(k, shape):
        return std * jax.random.normal(k, shape, dtype=jnp.float32)

    keys = jax.random.split(key, 2 + n_layer)
    params = {}
    wte = normal(keys[0], (vocab_size, C))
    params['wte'] = wte                                   # (vocab, C) for embedding gather
    params['wpe'] = normal(keys[1], (block_size, C))
    blocks = []
    for l in range(n_layer):
        kk = jax.random.split(keys[2 + l], 4)
        blk = dict(
            ln1_g=jnp.ones((C,), jnp.float32),
            ln1_b=jnp.zeros((C,), jnp.float32),
            attn_w=normal(kk[0], (C, 3 * C)).astype(jnp.bfloat16),
            attn_b=jnp.zeros((3 * C,), jnp.float32),
            proj_w=normal(kk[1], (C, C)).astype(jnp.bfloat16),
            proj_b=jnp.zeros((C,), jnp.float32),
            ln2_g=jnp.ones((C,), jnp.float32),
            ln2_b=jnp.zeros((C,), jnp.float32),
            fc_w=normal(kk[2], (C, 4 * C)).astype(jnp.bfloat16),
            fc_b=jnp.zeros((4 * C,), jnp.float32),
            mlp_proj_w=normal(kk[3], (4 * C, C)).astype(jnp.bfloat16),
            mlp_proj_b=jnp.zeros((C,), jnp.float32),
        )
        blocks.append(blk)
    params['blocks'] = blocks
    params['lnf_g'] = jnp.ones((C,), jnp.float32)
    params['lnf_b'] = jnp.zeros((C,), jnp.float32)
    # tied lm_head weight: transposed ONCE here (not every forward), bf16 for MXU
    params['lm_head_w'] = wte.T.astype(jnp.bfloat16)      # (C, vocab)
    params['lm_head_b'] = jnp.zeros((vocab_size,), jnp.float32)
    return params


# ----------------------------------------------------------------------------
# GPT forward
# ----------------------------------------------------------------------------

def gpt_forward(idx, params, *, n_head):
    B, T = idx.shape
    C = params['wte'].shape[1]
    hd = C // n_head

    # embedding gathers stay in plain JAX (glue)
    tok_emb = params['wte'][idx]                          # (B, T, C)
    pos_emb = params['wpe'][:T]                           # (T, C)
    x = (tok_emb + pos_emb[None, :, :]).reshape(B * T, C)

    for blk in params['blocks']:
        # --- attention: ln_1 fused into the qkv projection ---
        qkv = ln_matmul(x, blk['ln1_g'], blk['ln1_b'],
                        blk['attn_w'], blk['attn_b'])     # (B*T, 3C)
        qkv = qkv.reshape(B, T, 3, n_head, hd)
        # TODO(synk): head slicing via BlockSpec index_map (no transpose) needs
        # last-dim blocks of head_dim < 128; kept as XLA transposes for safe lowering.
        q = qkv[:, :, 0].transpose(0, 2, 1, 3)            # (B, H, T, hd)
        k = qkv[:, :, 1].transpose(0, 2, 1, 3)
        v = qkv[:, :, 2].transpose(0, 2, 1, 3)
        y = causal_attention(q, k, v)                     # (B, H, T, hd)
        y = y.transpose(0, 2, 1, 3).reshape(B * T, C)
        # output projection with fused residual add
        x = matmul(y, blk['proj_w'], blk['proj_b'], residual=x)

        # --- MLP: ln_2 fused into c_fc + GELU(tanh); residual fused into c_proj ---
        h = ln_matmul(x, blk['ln2_g'], blk['ln2_b'],
                      blk['fc_w'], blk['fc_b'], activation="gelu")
        x = matmul(h, blk['mlp_proj_w'], blk['mlp_proj_b'], residual=x)

    # final LayerNorm fused into the tied lm_head (bias-free)
    logits = ln_matmul(x, params['lnf_g'], params['lnf_b'],
                       params['lm_head_w'], params['lm_head_b'])
    return logits.reshape(B, T, -1)
    # TODO(synk): cross-entropy loss branch (targets != None) not implemented.


# ----------------------------------------------------------------------------
# Main
# ----------------------------------------------------------------------------

if __name__ == "__main__":
    # small config consistent with GPTConfig semantics
    vocab_size = 128
    block_size = 16
    n_layer = 2
    n_head = 4
    n_embd = 32
    B, T = 2, 8

    key = jax.random.PRNGKey(0)
    k_params, k_idx = jax.random.split(key)
    params = init_params(k_params, vocab_size=vocab_size, block_size=block_size,
                         n_layer=n_layer, n_head=n_head, n_embd=n_embd)
    idx = jax.random.randint(k_idx, (B, T), 0, vocab_size, dtype=jnp.int32)

    logits = jax.jit(functools.partial(gpt_forward, n_head=n_head))(idx, params)
    logits = jax.block_until_ready(logits)

    assert logits.shape == (B, T, vocab_size)
    assert bool(jnp.all(jnp.isfinite(logits)))
    print("KERNEL_OK")
</pallas_src>

<mosaic_0001>
module attributes {stable_mosaic.version = 11 : i64} {
  func.func @_ln_matmul_kernel(%arg0: i32, %arg1: i32, %arg2: memref<16x32xf32, #tpu.memory_space<vmem>>, %arg3: memref<1x32xf32, #tpu.memory_space<vmem>>, %arg4: memref<1x32xf32, #tpu.memory_space<vmem>>, %arg5: memref<32x96xbf16, #tpu.memory_space<vmem>>, %arg6: memref<1x96xf32, #tpu.memory_space<vmem>>, %arg7: memref<16x96xf32, #tpu.memory_space<vmem>>) attributes {dimension_semantics = [#tpu.dimension_semantics<parallel>, #tpu.dimension_semantics<parallel>], iteration_bounds = array<i64: 1, 1>, scalar_prefetch = 0 : i64, scratch_operands = 0 : i64, tpu.core_type = #tpu.core_type<tc>, window_params = [{transform_indices = @transform_0, window_bounds = array<i64: 16, 32>}, {pipeline_mode = #tpu.pipeline_mode<synchronous>, transform_indices = @transform_1, window_bounds = array<i64: 1, 32>}, {pipeline_mode = #tpu.pipeline_mode<synchronous>, transform_indices = @transform_2, window_bounds = array<i64: 1, 32>}, {transform_indices = @transform_3, window_bounds = array<i64: 32, 96>}, {transform_indices = @transform_4, window_bounds = array<i64: 1, 96>}, {transform_indices = @transform_5, window_bounds = array<i64: 16, 96>}]} {
    %c0 = arith.constant 0 : index
    %c0_0 = arith.constant 0 : index
    %0 = vector.load %arg2[%c0, %c0_0] : memref<16x32xf32, #tpu.memory_space<vmem>>, vector<16x32xf32>
    %cst = arith.constant dense<0.000000e+00> : vector<16xf32>
    %1 = vector.multi_reduction <add>, %0, %cst [1] : vector<16x32xf32> to vector<16xf32>
    %2 = vector.shape_cast %1 : vector<16xf32> to vector<16x1xf32>
    %cst_1 = arith.constant 3.200000e+01 : f32
    %3 = vector.broadcast %cst_1 : f32 to vector<16x1xf32>
    %4 = arith.divf %2, %3 : vector<16x1xf32>
    %5 = vector.broadcast %4 : vector<16x1xf32> to vector<16x32xf32>
    %6 = arith.subf %0, %5 : vector<16x32xf32>
    %7 = arith.mulf %6, %6 : vector<16x32xf32>
    %cst_2 = arith.constant dense<0.000000e+00> : vector<16xf32>
    %8 = vector.multi_reduction <add>, %7, %cst_2 [1] : vector<16x32xf32> to vector<16xf32>
    %9 = vector.shape_cast %8 : vector<16xf32> to vector<16x1xf32>
    %cst_3 = arith.constant 3.200000e+01 : f32
    %10 = vector.broadcast %cst_3 : f32 to vector<16x1xf32>
    %11 = arith.divf %9, %10 : vector<16x1xf32>
    %12 = vector.broadcast %4 : vector<16x1xf32> to vector<16x32xf32>
    %13 = arith.subf %0, %12 : vector<16x32xf32>
    %cst_4 = arith.constant 9.99999974E-6 : f32
    %14 = vector.broadcast %cst_4 : f32 to vector<16x1xf32>
    %15 = arith.addf %11, %14 : vector<16x1xf32>
    %16 = math.rsqrt %15 : vector<16x1xf32>
    %17 = vector.broadcast %16 : vector<16x1xf32> to vector<16x32xf32>
    %18 = arith.mulf %13, %17 : vector<16x32xf32>
    %c0_5 = arith.constant 0 : index
    %c0_6 = arith.constant 0 : index
    %19 = vector.load %arg3[%c0_5, %c0_6] : memref<1x32xf32, #tpu.memory_space<vmem>>, vector<1x32xf32>
    %20 = vector.broadcast %19 : vector<1x32xf32> to vector<16x32xf32>
    %21 = arith.mulf %18, %20 : vector<16x32xf32>
    %c0_7 = arith.constant 0 : index
    %c0_8 = arith.constant 0 : index
    %22 = vector.load %arg4[%c0_7, %c0_8] : memref<1x32xf32, #tpu.memory_space<vmem>>, vector<1x32xf32>
    %23 = vector.broadcast %22 : vector<1x32xf32> to vector<16x32xf32>
    %24 = arith.addf %21, %23 : vector<16x32xf32>
    %25 = arith.truncf %24 : vector<16x32xf32> to vector<16x32xbf16>
    %c0_9 = arith.constant 0 : index
    %c0_10 = arith.constant 0 : index
    %26 = vector.load %arg5[%c0_9, %c0_10] : memref<32x96xbf16, #tpu.memory_space<vmem>>, vector<32x96xbf16>
    %cst_11 = arith.constant dense<0.000000e+00> : vector<16x96xf32>
    %27 = tpu.matmul %25, %26, %cst_11 {dimension_numbers = #tpu.dot_dimension_numbers<[1], [0], [0], [1], [0, 0, 1, 1], [], []>} : vector<16x32xbf16>, vector<32x96xbf16>, vector<16x96xf32> -> vector<16x96xf32>
    %c0_12 = arith.constant 0 : index
    %c0_13 = arith.constant 0 : index
    %28 = vector.load %arg6[%c0_12, %c0_13] : memref<1x96xf32, #tpu.memory_space<vmem>>, vector<1x96xf32>
    %29 = vector.broadcast %28 : vector<1x96xf32> to vector<16x96xf32>
    %30 = arith.addf %27, %29 : vector<16x96xf32>
    %c0_14 = arith.constant 0 : index
    %c0_15 = arith.constant 0 : index
    %31 = vector.load %arg7[%c0_14, %c0_15] : memref<16x96xf32, #tpu.memory_space<vmem>>, vector<16x96xf32>
    tpu.vector_store %arg7[%c0_14, %c0_15], %30 {strides = array<i32>} : memref<16x96xf32, #tpu.memory_space<vmem>>, vector<16x96xf32>,
    return
  }
  func.func @transform_0(%arg0: i32, %arg1: i32) -> (i32, i32) {
    %c0_i32 = arith.constant 0 : i32
    %c0_i32_0 = arith.constant 0 : i32
    return %arg0, %c0_i32 : i32, i32
  }
  func.func @transform_1(%arg0: i32, %arg1: i32) -> (i32, i32) {
    %c0_i32 = arith.constant 0 : i32
    %c0_i32_0 = arith.constant 0 : i32
    %c0_i32_1 = arith.constant 0 : i32
    return %c0_i32, %c0_i32_0 : i32, i32
  }
  func.func @transform_2(%arg0: i32, %arg1: i32) -> (i32, i32) {
    %c0_i32 = arith.constant 0 : i32
    %c0_i32_0 = arith.constant 0 : i32
    %c0_i32_1 = arith.constant 0 : i32
    return %c0_i32, %c0_i32_0 : i32, i32
  }
  func.func @transform_3(%arg0: i32, %arg1: i32) -> (i32, i32) {
    %c0_i32 = arith.constant 0 : i32
    %c0_i32_0 = arith.constant 0 : i32
    return %c0_i32, %arg1 : i32, i32
  }
  func.func @transform_4(%arg0: i32, %arg1: i32) -> (i32, i32) {
    %c0_i32 = arith.constant 0 : i32
    %c0_i32_0 = arith.constant 0 : i32
    return %c0_i32, %arg1 : i32, i32
  }
  func.func @transform_5(%arg0: i32, %arg1: i32) -> (i32, i32) {
    %c0_i32 = arith.constant 0 : i32
    return %arg0, %arg1 : i32, i32
  }
}

module attributes {stable_mosaic.version = 11 : i64} {
  func.func @_flash_attn_kernel(%arg0: i32, %arg1: i32, %arg2: i32, %arg3: memref<1x8x8xf32, #tpu.memory_space<vmem>>, %arg4: memref<1x8x8xf32, #tpu.memory_space<vmem>>, %arg5: memref<1x8x8xf32, #tpu.memory_space<vmem>>, %arg6: memref<1x8x8xf32, #tpu.memory_space<vmem>>, %arg7: memref<8x1xf32, #tpu.memory_space<vmem>>, %arg8: memref<8x1xf32, #tpu.memory_space<vmem>>, %arg9: memref<8x8xf32, #tpu.memory_space<vmem>>) attributes {dimension_semantics = [#tpu.dimension_semantics<parallel>, #tpu.dimension_semantics<parallel>, #tpu.dimension_semantics<arbitrary>], iteration_bounds = array<i64: 8, 1, 1>, scalar_prefetch = 0 : i64, scratch_operands = 3 : i64, tpu.core_type = #tpu.core_type<tc>, window_params = [{transform_indices = @transform_0, window_bounds = array<i64: 1, 8, 8>}, {transform_indices = @transform_1, window_bounds = array<i64: 1, 8, 8>}, {transform_indices = @transform_2, window_bounds = array<i64: 1, 8, 8>}, {transform_indices = @transform_3, window_bounds = array<i64: 1, 8, 8>}]} {
    %c0_i32 = arith.constant 0 : i32
    %0 = arith.cmpi eq, %arg2, %c0_i32 : i32
    %1 = arith.extui %0 : i1 to i32
    %c0_i32_0 = arith.constant 0 : i32
    %2 = arith.cmpi ne, %1, %c0_i32_0 : i32
    scf.if %2 {
      %cst = arith.constant 0xFF800000 : f32
      %12 = vector.broadcast %cst : f32 to vector<8x1xf32>
      %c0 = arith.constant 0 : index
      %c0_5 = arith.constant 0 : index
      %13 = vector.load %arg7[%c0, %c0_5] : memref<8x1xf32, #tpu.memory_space<vmem>>, vector<8x1xf32>
      tpu.vector_store %arg7[%c0, %c0_5], %12 {strides = array<i32>} : memref<8x1xf32, #tpu.memory_space<vmem>>, vector<8x1xf32>,
      %cst_6 = arith.constant 0.000000e+00 : f32
      %14 = vector.broadcast %cst_6 : f32 to vector<8x1xf32>
      %c0_7 = arith.constant 0 : index
      %c0_8 = arith.constant 0 : index
      %15 = vector.load %arg8[%c0_7, %c0_8] : memref<8x1xf32, #tpu.memory_space<vmem>>, vector<8x1xf32>
      tpu.vector_store %arg8[%c0_7, %c0_8], %14 {strides = array<i32>} : memref<8x1xf32, #tpu.memory_space<vmem>>, vector<8x1xf32>,
      %cst_9 = arith.constant 0.000000e+00 : f32
      %16 = vector.broadcast %cst_9 : f32 to vector<8x8xf32>
      %c0_10 = arith.constant 0 : index
      %c0_11 = arith.constant 0 : index
      %17 = vector.load %arg9[%c0_10, %c0_11] : memref<8x8xf32, #tpu.memory_space<vmem>>, vector<8x8xf32>
      tpu.vector_store %arg9[%c0_10, %c0_11], %16 {strides = array<i32>} : memref<8x8xf32, #tpu.memory_space<vmem>>, vector<8x8xf32>,
    } else {
    }
    %c8_i32 = arith.constant 8 : i32
    %3 = arith.muli %arg2, %c8_i32 : i32
    %c8_i32_1 = arith.constant 8 : i32
    %4 = arith.muli %arg1, %c8_i32_1 : i32
    %c7_i32 = arith.constant 7 : i32
    %5 = arith.addi %4, %c7_i32 : i32
    %6 = arith.cmpi sle, %3, %5 : i32
    %7 = arith.extui %6 : i1 to i32
    %c0_i32_2 = arith.constant 0 : i32
    %8 = arith.cmpi ne, %7, %c0_i32_2 : i32
    scf.if %8 {
      %c0 = arith.constant 0 : index
      %c0_5 = arith.constant 0 : index
      %c0_6 = arith.constant 0 : index
      %12 = vector.load %arg3[%c0, %c0_5, %c0_6] : memref<1x8x8xf32, #tpu.memory_space<vmem>>, vector<1x8x8xf32>
      %13 = vector.shape_cast %12 : vector<1x8x8xf32> to vector<8x8xf32>
      %cst = arith.constant 0.353553385 : f32
      %14 = vector.broadcast %cst : f32 to vector<8x8xf32>
      %15 = arith.mulf %13, %14 : vector<8x8xf32>
      %16 = arith.truncf %15 : vector<8x8xf32> to vector<8x8xbf16>
      %c0_7 = arith.constant 0 : index
      %c0_8 = arith.constant 0 : index
      %c0_9 = arith.constant 0 : index
      %17 = vector.load %arg4[%c0_7, %c0_8, %c0_9] : memref<1x8x8xf32, #tpu.memory_space<vmem>>, vector<1x8x8xf32>
      %18 = vector.shape_cast %17 : vector<1x8x8xf32> to vector<8x8xf32>
      %19 = arith.truncf %18 : vector<8x8xf32> to vector<8x8xbf16>
      %cst_10 = arith.constant dense<0.000000e+00> : vector<8x8xf32>
      %20 = tpu.matmul %16, %19, %cst_10 {dimension_numbers = #tpu.dot_dimension_numbers<[1], [1], [0], [0], [0, 0, 1, 0], [], []>} : vector<8x8xbf16>, vector<8x8xbf16>, vector<8x8xf32> -> vector<8x8xf32>
      %c8_i32_11 = arith.constant 8 : i32
      %21 = arith.muli %arg1, %c8_i32_11 : i32
      %22 = tpu.iota {dimensions = array<i32: 0>} : vector<8x8xi32>
      %23 = vector.broadcast %21 : i32 to vector<8x8xi32>
      %24 = arith.addi %23, %22 : vector<8x8xi32>
      %c8_i32_12 = arith.constant 8 : i32
      %25 = arith.muli %arg2, %c8_i32_12 : i32
      %26 = tpu.iota {dimensions = array<i32: 1>} : vector<8x8xi32>
      %27 = vector.broadcast %25 : i32 to vector<8x8xi32>
      %28 = arith.addi %27, %26 : vector<8x8xi32>
      %29 = arith.cmpi sle, %28, %24 : vector<8x8xi32>
      %cst_13 = arith.constant 0xFF800000 : f32
      %30 = vector.broadcast %cst_13 : f32 to vector<8x8xf32>
      %31 = arith.select %29, %20, %30 : vector<8x8xi1>, vector<8x8xf32>
      %c0_14 = arith.constant 0 : index
      %c0_15 = arith.constant 0 : index
      %32 = vector.load %arg7[%c0_14, %c0_15] : memref<8x1xf32, #tpu.memory_space<vmem>>, vector<8x1xf32>
      %cst_16 = arith.constant dense<0xFF800000> : vector<8xf32>
      %33 = vector.multi_reduction <maximumf>, %31, %cst_16 [1] : vector<8x8xf32> to vector<8xf32>
      %34 = vector.shape_cast %33 : vector<8xf32> to vector<8x1xf32>
      %35 = arith.maximumf %32, %34 : vector<8x1xf32>
      %36 = arith.subf %32, %35 : vector<8x1xf32>
      %37 = math.exp %36 : vector<8x1xf32>
      %38 = vector.broadcast %35 : vector<8x1xf32> to vector<8x8xf32>
      %39 = arith.subf %31, %38 : vector<8x8xf32>
      %40 = math.exp %39 : vector<8x8xf32>
      %c0_17 = arith.constant 0 : index
      %c0_18 = arith.constant 0 : index
      %41 = vector.load %arg8[%c0_17, %c0_18] : memref<8x1xf32, #tpu.memory_space<vmem>>, vector<8x1xf32>
      %42 = arith.mulf %37, %41 : vector<8x1xf32>
      %cst_19 = arith.constant dense<0.000000e+00> : vector<8xf32>
      %43 = vector.multi_reduction <add>, %40, %cst_19 [1] : vector<8x8xf32> to vector<8xf32>
      %44 = vector.shape_cast %43 : vector<8xf32> to vector<8x1xf32>
      %45 = arith.addf %42, %44 : vector<8x1xf32>
      %c0_20 = arith.constant 0 : index
      %c0_21 = arith.constant 0 : index
      %46 = vector.load %arg8[%c0_20, %c0_21] : memref<8x1xf32, #tpu.memory_space<vmem>>, vector<8x1xf32>
      tpu.vector_store %arg8[%c0_20, %c0_21], %45 {strides = array<i32>} : memref<8x1xf32, #tpu.memory_space<vmem>>, vector<8x1xf32>,
      %c0_22 = arith.constant 0 : index
      %c0_23 = arith.constant 0 : index
      %47 = vector.load %arg9[%c0_22, %c0_23] : memref<8x8xf32, #tpu.memory_space<vmem>>, vector<8x8xf32>
      %48 = vector.broadcast %37 : vector<8x1xf32> to vector<8x8xf32>
      %49 = arith.mulf %48, %47 : vector<8x8xf32>
      %50 = arith.truncf %40 : vector<8x8xf32> to vector<8x8xbf16>
      %c0_24 = arith.constant 0 : index
      %c0_25 = arith.constant 0 : index
      %c0_26 = arith.constant 0 : index
      %51 = vector.load %arg5[%c0_24, %c0_25, %c0_26] : memref<1x8x8xf32, #tpu.memory_space<vmem>>, vector<1x8x8xf32>
      %52 = vector.shape_cast %51 : vector<1x8x8xf32> to vector<8x8xf32>
      %53 = arith.truncf %52 : vector<8x8xf32> to vector<8x8xbf16>
      %cst_27 = arith.constant dense<0.000000e+00> : vector<8x8xf32>
      %54 = tpu.matmul %50, %53, %cst_27 {dimension_numbers = #tpu.dot_dimension_numbers<[1], [0], [0], [1], [0, 0, 1, 1], [], []>} : vector<8x8xbf16>, vector<8x8xbf16>, vector<8x8xf32> -> vector<8x8xf32>
      %55 = arith.addf %49, %54 : vector<8x8xf32>
      %c0_28 = arith.constant 0 : index
      %c0_29 = arith.constant 0 : index
      %56 = vector.load %arg9[%c0_28, %c0_29] : memref<8x8xf32, #tpu.memory_space<vmem>>, vector<8x8xf32>
      tpu.vector_store %arg9[%c0_28, %c0_29], %55 {strides = array<i32>} : memref<8x8xf32, #tpu.memory_space<vmem>>, vector<8x8xf32>,
      %c0_30 = arith.constant 0 : index
      %c0_31 = arith.constant 0 : index
      %57 = vector.load %arg7[%c0_30, %c0_31] : memref<8x1xf32, #tpu.memory_space<vmem>>, vector<8x1xf32>
      tpu.vector_store %arg7[%c0_30, %c0_31], %35 {strides = array<i32>} : memref<8x1xf32, #tpu.memory_space<vmem>>, vector<8x1xf32>,
    } else {
    }
    %c0_i32_3 = arith.constant 0 : i32
    %9 = arith.cmpi eq, %arg2, %c0_i32_3 : i32
    %10 = arith.extui %9 : i1 to i32
    %c0_i32_4 = arith.constant 0 : i32
    %11 = arith.cmpi ne, %10, %c0_i32_4 : i32
    scf.if %11 {
      %c0 = arith.constant 0 : index
      %c0_5 = arith.constant 0 : index
      %12 = vector.load %arg8[%c0, %c0_5] : memref<8x1xf32, #tpu.memory_space<vmem>>, vector<8x1xf32>
      %13 = tpu.reciprocal %12 {approx = true} : vector<8x1xf32> -> vector<8x1xf32>
      %c0_6 = arith.constant 0 : index
      %c0_7 = arith.constant 0 : index
      %14 = vector.load %arg9[%c0_6, %c0_7] : memref<8x8xf32, #tpu.memory_space<vmem>>, vector<8x8xf32>
      %15 = vector.broadcast %13 : vector<8x1xf32> to vector<8x8xf32>
      %16 = arith.mulf %14, %15 : vector<8x8xf32>
      %c0_8 = arith.constant 0 : index
      %c0_9 = arith.constant 0 : index
      %c0_10 = arith.constant 0 : index
      %17 = vector.load %arg6[%c0_8, %c0_9, %c0_10] : memref<1x8x8xf32, #tpu.memory_space<vmem>>, vector<1x8x8xf32>
      %18 = vector.shape_cast %17 : vector<1x8x8xf32> to vector<8x8xf32>
      %19 = vector.shape_cast %16 : vector<8x8xf32> to vector<1x8x8xf32>
      tpu.vector_store %arg6[%c0_8, %c0_9, %c0_10], %19 {strides = array<i32>} : memref<1x8x8xf32, #tpu.memory_space<vmem>>, vector<1x8x8xf32>,
    } else {
    }
    return
  }
  func.func @transform_0(%arg0: i32, %arg1: i32, %arg2: i32) -> (i32, i32, i32) {
    %c0_i32 = arith.constant 0 : i32
    %c0_i32_0 = arith.constant 0 : i32
    return %arg0, %arg1, %c0_i32 : i32, i32, i32
  }
  func.func @transform_1(%arg0: i32, %arg1: i32, %arg2: i32) -> (i32, i32, i32) {
    %c0_i32 = arith.constant 0 : i32
    %c0_i32_0 = arith.constant 0 : i32
    return %arg0, %arg2, %c0_i32 : i32, i32, i32
  }
  func.func @transform_2(%arg0: i32, %arg1: i32, %arg2: i32) -> (i32, i32, i32) {
    %c0_i32 = arith.constant 0 : i32
    %c0_i32_0 = arith.constant 0 : i32
    return %arg0, %arg2, %c0_i32 : i32, i32, i32
  }
  func.func @transform_3(%arg0: i32, %arg1: i32, %arg2: i32) -> (i32, i32, i32) {
    %c0_i32 = arith.constant 0 : i32
    %c0_i32_0 = arith.constant 0 : i32
    return %arg0, %arg1, %c0_i32 : i32, i32, i32
  }
}

module attributes {stable_mosaic.version = 11 : i64} {
  func.func @_matmul_kernel(%arg0: i32, %arg1: i32, %arg2: i32, %arg3: memref<16x32xf32, #tpu.memory_space<vmem>>, %arg4: memref<32x32xbf16, #tpu.memory_space<vmem>>, %arg5: memref<1x32xf32, #tpu.memory_space<vmem>>, %arg6: memref<16x32xf32, #tpu.memory_space<vmem>>, %arg7: memref<16x32xf32, #tpu.memory_space<vmem>>, %arg8: memref<16x32xf32, #tpu.memory_space<vmem>>) attributes {dimension_semantics = [#tpu.dimension_semantics<parallel>, #tpu.dimension_semantics<parallel>, #tpu.dimension_semantics<arbitrary>], iteration_bounds = array<i64: 1, 1, 1>, scalar_prefetch = 0 : i64, scratch_operands = 1 : i64, tpu.core_type = #tpu.core_type<tc>, window_params = [{transform_indices = @transform_0, window_bounds = array<i64: 16, 32>}, {transform_indices = @transform_1, window_bounds = array<i64: 32, 32>}, {transform_indices = @transform_2, window_bounds = array<i64: 1, 32>}, {transform_indices = @transform_3, window_bounds = array<i64: 16, 32>}, {transform_indices = @transform_4, window_bounds = array<i64: 16, 32>}]} {
    %c0_i32 = arith.constant 0 : i32
    %0 = arith.cmpi eq, %arg2, %c0_i32 : i32
    %1 = arith.extui %0 : i1 to i32
    %c0_i32_0 = arith.constant 0 : i32
    %2 = arith.cmpi ne, %1, %c0_i32_0 : i32
    scf.if %2 {
      %cst_10 = arith.constant 0.000000e+00 : f32
      %13 = vector.broadcast %cst_10 : f32 to vector<16x32xf32>
      %c0_11 = arith.constant 0 : index
      %c0_12 = arith.constant 0 : index
      %14 = vector.load %arg8[%c0_11, %c0_12] : memref<16x32xf32, #tpu.memory_space<vmem>>, vector<16x32xf32>
      tpu.vector_store %arg8[%c0_11, %c0_12], %13 {strides = array<i32>} : memref<16x32xf32, #tpu.memory_space<vmem>>, vector<16x32xf32>,
    } else {
    }
    %c0 = arith.constant 0 : index
    %c0_1 = arith.constant 0 : index
    %3 = vector.load %arg8[%c0, %c0_1] : memref<16x32xf32, #tpu.memory_space<vmem>>, vector<16x32xf32>
    %c0_2 = arith.constant 0 : index
    %c0_3 = arith.constant 0 : index
    %4 = vector.load %arg3[%c0_2, %c0_3] : memref<16x32xf32, #tpu.memory_space<vmem>>, vector<16x32xf32>
    %5 = arith.truncf %4 : vector<16x32xf32> to vector<16x32xbf16>
    %c0_4 = arith.constant 0 : index
    %c0_5 = arith.constant 0 : index
    %6 = vector.load %arg4[%c0_4, %c0_5] : memref<32x32xbf16, #tpu.memory_space<vmem>>, vector<32x32xbf16>
    %cst = arith.constant dense<0.000000e+00> : vector<16x32xf32>
    %7 = tpu.matmul %5, %6, %cst {dimension_numbers = #tpu.dot_dimension_numbers<[1], [0], [0], [1], [0, 0, 1, 1], [], []>} : vector<16x32xbf16>, vector<32x32xbf16>, vector<16x32xf32> -> vector<16x32xf32>
    %8 = arith.addf %3, %7 : vector<16x32xf32>
    %c0_6 = arith.constant 0 : index
    %c0_7 = arith.constant 0 : index
    %9 = vector.load %arg8[%c0_6, %c0_7] : memref<16x32xf32, #tpu.memory_space<vmem>>, vector<16x32xf32>
    tpu.vector_store %arg8[%c0_6, %c0_7], %8 {strides = array<i32>} : memref<16x32xf32, #tpu.memory_space<vmem>>, vector<16x32xf32>,
    %c0_i32_8 = arith.constant 0 : i32
    %10 = arith.cmpi eq, %arg2, %c0_i32_8 : i32
    %11 = arith.extui %10 : i1 to i32
    %c0_i32_9 = arith.constant 0 : i32
    %12 = arith.cmpi ne, %11, %c0_i32_9 : i32
    scf.if %12 {
      %c0_10 = arith.constant 0 : index
      %c0_11 = arith.constant 0 : index
      %13 = vector.load %arg8[%c0_10, %c0_11] : memref<16x32xf32, #tpu.memory_space<vmem>>, vector<16x32xf32>
      %c0_12 = arith.constant 0 : index
      %c0_13 = arith.constant 0 : index
      %14 = vector.load %arg5[%c0_12, %c0_13] : memref<1x32xf32, #tpu.memory_space<vmem>>, vector<1x32xf32>
      %15 = vector.broadcast %14 : vector<1x32xf32> to vector<16x32xf32>
      %16 = arith.addf %13, %15 : vector<16x32xf32>
      %c0_14 = arith.constant 0 : index
      %c0_15 = arith.constant 0 : index
      %17 = vector.load %arg6[%c0_14, %c0_15] : memref<16x32xf32, #tpu.memory_space<vmem>>, vector<16x32xf32>
      %18 = arith.addf %16, %17 : vector<16x32xf32>
      %c0_16 = arith.constant 0 : index
      %c0_17 = arith.constant 0 : index
      %19 = vector.load %arg7[%c0_16, %c0_17] : memref<16x32xf32, #tpu.memory_space<vmem>>, vector<16x32xf32>
      tpu.vector_store %arg7[%c0_16, %c0_17], %18 {strides = array<i32>} : memref<16x32xf32, #tpu.memory_space<vmem>>, vector<16x32xf32>,
    } else {
    }
    return
  }
  func.func @transform_0(%arg0: i32, %arg1: i32, %arg2: i32) -> (i32, i32) {
    %c0_i32 = arith.constant 0 : i32
    return %arg0, %arg2 : i32, i32
  }
  func.func @transform_1(%arg0: i32, %arg1: i32, %arg2: i32) -> (i32, i32) {
    %c0_i32 = arith.constant 0 : i32
    return %arg2, %arg1 : i32, i32
  }
  func.func @transform_2(%arg0: i32, %arg1: i32, %arg2: i32) -> (i32, i32) {
    %c0_i32 = arith.constant 0 : i32
    %c0_i32_0 = arith.constant 0 : i32
    return %c0_i32, %arg1 : i32, i32
  }
  func.func @transform_3(%arg0: i32, %arg1: i32, %arg2: i32) -> (i32, i32) {
    %c0_i32 = arith.constant 0 : i32
    return %arg0, %arg1 : i32, i32
  }
  func.func @transform_4(%arg0: i32, %arg1: i32, %arg2: i32) -> (i32, i32) {
    %c0_i32 = arith.constant 0 : i32
    return %arg0, %arg1 : i32, i32
  }
}

module attributes {stable_mosaic.version = 11 : i64} {
  func.func @_ln_matmul_kernel(%arg0: i32, %arg1: i32, %arg2: memref<16x32xf32, #tpu.memory_space<vmem>>, %arg3: memref<1x32xf32, #tpu.memory_space<vmem>>, %arg4: memref<1x32xf32, #tpu.memory_space<vmem>>, %arg5: memref<32x128xbf16, #tpu.memory_space<vmem>>, %arg6: memref<1x128xf32, #tpu.memory_space<vmem>>, %arg7: memref<16x128xf32, #tpu.memory_space<vmem>>) attributes {dimension_semantics = [#tpu.dimension_semantics<parallel>, #tpu.dimension_semantics<parallel>], iteration_bounds = array<i64: 1, 1>, scalar_prefetch = 0 : i64, scratch_operands = 0 : i64, tpu.core_type = #tpu.core_type<tc>, window_params = [{transform_indices = @transform_0, window_bounds = array<i64: 16, 32>}, {pipeline_mode = #tpu.pipeline_mode<synchronous>, transform_indices = @transform_1, window_bounds = array<i64: 1, 32>}, {pipeline_mode = #tpu.pipeline_mode<synchronous>, transform_indices = @transform_2, window_bounds = array<i64: 1, 32>}, {transform_indices = @transform_3, window_bounds = array<i64: 32, 128>}, {transform_indices = @transform_4, window_bounds = array<i64: 1, 128>}, {transform_indices = @transform_5, window_bounds = array<i64: 16, 128>}]} {
    %c0 = arith.constant 0 : index
    %c0_0 = arith.constant 0 : index
    %0 = vector.load %arg2[%c0, %c0_0] : memref<16x32xf32, #tpu.memory_space<vmem>>, vector<16x32xf32>
    %cst = arith.constant dense<0.000000e+00> : vector<16xf32>
    %1 = vector.multi_reduction <add>, %0, %cst [1] : vector<16x32xf32> to vector<16xf32>
    %2 = vector.shape_cast %1 : vector<16xf32> to vector<16x1xf32>
    %cst_1 = arith.constant 3.200000e+01 : f32
    %3 = vector.broadcast %cst_1 : f32 to vector<16x1xf32>
    %4 = arith.divf %2, %3 : vector<16x1xf32>
    %5 = vector.broadcast %4 : vector<16x1xf32> to vector<16x32xf32>
    %6 = arith.subf %0, %5 : vector<16x32xf32>
    %7 = arith.mulf %6, %6 : vector<16x32xf32>
    %cst_2 = arith.constant dense<0.000000e+00> : vector<16xf32>
    %8 = vector.multi_reduction <add>, %7, %cst_2 [1] : vector<16x32xf32> to vector<16xf32>
    %9 = vector.shape_cast %8 : vector<16xf32> to vector<16x1xf32>
    %cst_3 = arith.constant 3.200000e+01 : f32
    %10 = vector.broadcast %cst_3 : f32 to vector<16x1xf32>
    %11 = arith.divf %9, %10 : vector<16x1xf32>
    %12 = vector.broadcast %4 : vector<16x1xf32> to vector<16x32xf32>
    %13 = arith.subf %0, %12 : vector<16x32xf32>
    %cst_4 = arith.constant 9.99999974E-6 : f32
    %14 = vector.broadcast %cst_4 : f32 to vector<16x1xf32>
    %15 = arith.addf %11, %14 : vector<16x1xf32>
    %16 = math.rsqrt %15 : vector<16x1xf32>
    %17 = vector.broadcast %16 : vector<16x1xf32> to vector<16x32xf32>
    %18 = arith.mulf %13, %17 : vector<16x32xf32>
    %c0_5 = arith.constant 0 : index
    %c0_6 = arith.constant 0 : index
    %19 = vector.load %arg3[%c0_5, %c0_6] : memref<1x32xf32, #tpu.memory_space<vmem>>, vector<1x32xf32>
    %20 = vector.broadcast %19 : vector<1x32xf32> to vector<16x32xf32>
    %21 = arith.mulf %18, %20 : vector<16x32xf32>
    %c0_7 = arith.constant 0 : index
    %c0_8 = arith.constant 0 : index
    %22 = vector.load %arg4[%c0_7, %c0_8] : memref<1x32xf32, #tpu.memory_space<vmem>>, vector<1x32xf32>
    %23 = vector.broadcast %22 : vector<1x32xf32> to vector<16x32xf32>
    %24 = arith.addf %21, %23 : vector<16x32xf32>
    %25 = arith.truncf %24 : vector<16x32xf32> to vector<16x32xbf16>
    %c0_9 = arith.constant 0 : index
    %c0_10 = arith.constant 0 : index
    %26 = vector.load %arg5[%c0_9, %c0_10] : memref<32x128xbf16, #tpu.memory_space<vmem>>, vector<32x128xbf16>
    %cst_11 = arith.constant dense<0.000000e+00> : vector<16x128xf32>
    %27 = tpu.matmul %25, %26, %cst_11 {dimension_numbers = #tpu.dot_dimension_numbers<[1], [0], [0], [1], [0, 0, 1, 1], [], []>} : vector<16x32xbf16>, vector<32x128xbf16>, vector<16x128xf32> -> vector<16x128xf32>
    %c0_12 = arith.constant 0 : index
    %c0_13 = arith.constant 0 : index
    %28 = vector.load %arg6[%c0_12, %c0_13] : memref<1x128xf32, #tpu.memory_space<vmem>>, vector<1x128xf32>
    %29 = vector.broadcast %28 : vector<1x128xf32> to vector<16x128xf32>
    %30 = arith.addf %27, %29 : vector<16x128xf32>
    %cst_14 = arith.constant 5.000000e-01 : f32
    %31 = vector.broadcast %cst_14 : f32 to vector<16x128xf32>
    %32 = arith.mulf %31, %30 : vector<16x128xf32>
    %cst_15 = arith.constant 4.471500e-02 : f32
    %33 = vector.broadcast %cst_15 : f32 to vector<16x128xf32>
    %34 = arith.mulf %33, %30 : vector<16x128xf32>
    %35 = arith.mulf %34, %30 : vector<16x128xf32>
    %36 = arith.mulf %35, %30 : vector<16x128xf32>
    %37 = arith.addf %30, %36 : vector<16x128xf32>
    %cst_16 = arith.constant 0.797884583 : f32
    %38 = vector.broadcast %cst_16 : f32 to vector<16x128xf32>
    %39 = arith.mulf %38, %37 : vector<16x128xf32>
    %40 = math.tanh %39 : vector<16x128xf32>
    %cst_17 = arith.constant 1.000000e+00 : f32
    %41 = vector.broadcast %cst_17 : f32 to vector<16x128xf32>
    %42 = arith.addf %41, %40 : vector<16x128xf32>
    %43 = arith.mulf %32, %42 : vector<16x128xf32>
    %c0_18 = arith.constant 0 : index
    %c0_19 = arith.constant 0 : index
    %44 = vector.load %arg7[%c0_18, %c0_19] : memref<16x128xf32, #tpu.memory_space<vmem>>, vector<16x128xf32>
    tpu.vector_store %arg7[%c0_18, %c0_19], %43 {strides = array<i32>} : memref<16x128xf32, #tpu.memory_space<vmem>>, vector<16x128xf32>,
    return
  }
  func.func @transform_0(%arg0: i32, %arg1: i32) -> (i32, i32) {
    %c0_i32 = arith.constant 0 : i32
    %c0_i32_0 = arith.constant 0 : i32
    return %arg0, %c0_i32 : i32, i32
  }
  func.func @transform_1(%arg0: i32, %arg1: i32) -> (i32, i32) {
    %c0_i32 = arith.constant 0 : i32
    %c0_i32_0 = arith.constant 0 : i32
    %c0_i32_1 = arith.constant 0 : i32
    return %c0_i32, %c0_i32_0 : i32, i32
  }
  func.func @transform_2(%arg0: i32, %arg1: i32) -> (i32, i32) {
    %c0_i32 = arith.constant 0 : i32
    %c0_i32_0 = arith.constant 0 : i32
    %c0_i32_1 = arith.constant 0 : i32
    return %c0_i32, %c0_i32_0 : i32, i32
  }
  func.func @transform_3(%arg0: i32, %arg1: i32) -> (i32, i32) {
    %c0_i32 = arith.constant 0 : i32
    %c0_i32_0 = arith.constant 0 : i32
    return %c0_i32, %arg1 : i32, i32
  }
  func.func @transform_4(%arg0: i32, %arg1: i32) -> (i32, i32) {
    %c0_i32 = arith.constant 0 : i32
    %c0_i32_0 = arith.constant 0 : i32
    return %c0_i32, %arg1 : i32, i32
  }
  func.func @transform_5(%arg0: i32, %arg1: i32) -> (i32, i32) {
    %c0_i32 = arith.constant 0 : i32
    return %arg0, %arg1 : i32, i32
  }
}

module attributes {stable_mosaic.version = 11 : i64} {
  func.func @_matmul_kernel(%arg0: i32, %arg1: i32, %arg2: i32, %arg3: memref<16x128xf32, #tpu.memory_space<vmem>>, %arg4: memref<128x32xbf16, #tpu.memory_space<vmem>>, %arg5: memref<1x32xf32, #tpu.memory_space<vmem>>, %arg6: memref<16x32xf32, #tpu.memory_space<vmem>>, %arg7: memref<16x32xf32, #tpu.memory_space<vmem>>, %arg8: memref<16x32xf32, #tpu.memory_space<vmem>>) attributes {dimension_semantics = [#tpu.dimension_semantics<parallel>, #tpu.dimension_semantics<parallel>, #tpu.dimension_semantics<arbitrary>], iteration_bounds = array<i64: 1, 1, 1>, scalar_prefetch = 0 : i64, scratch_operands = 1 : i64, tpu.core_type = #tpu.core_type<tc>, window_params = [{transform_indices = @transform_0, window_bounds = array<i64: 16, 128>}, {transform_indices = @transform_1, window_bounds = array<i64: 128, 32>}, {transform_indices = @transform_2, window_bounds = array<i64: 1, 32>}, {transform_indices = @transform_3, window_bounds = array<i64: 16, 32>}, {transform_indices = @transform_4, window_bounds = array<i64: 16, 32>}]} {
    %c0_i32 = arith.constant 0 : i32
    %0 = arith.cmpi eq, %arg2, %c0_i32 : i32
    %1 = arith.extui %0 : i1 to i32
    %c0_i32_0 = arith.constant 0 : i32
    %2 = arith.cmpi ne, %1, %c0_i32_0 : i32
    scf.if %2 {
      %cst_10 = arith.constant 0.000000e+00 : f32
      %13 = vector.broadcast %cst_10 : f32 to vector<16x32xf32>
      %c0_11 = arith.constant 0 : index
      %c0_12 = arith.constant 0 : index
      %14 = vector.load %arg8[%c0_11, %c0_12] : memref<16x32xf32, #tpu.memory_space<vmem>>, vector<16x32xf32>
      tpu.vector_store %arg8[%c0_11, %c0_12], %13 {strides = array<i32>} : memref<16x32xf32, #tpu.memory_space<vmem>>, vector<16x32xf32>,
    } else {
    }
    %c0 = arith.constant 0 : index
    %c0_1 = arith.constant 0 : index
    %3 = vector.load %arg8[%c0, %c0_1] : memref<16x32xf32, #tpu.memory_space<vmem>>, vector<16x32xf32>
    %c0_2 = arith.constant 0 : index
    %c0_3 = arith.constant 0 : index
    %4 = vector.load %arg3[%c0_2, %c0_3] : memref<16x128xf32, #tpu.memory_space<vmem>>, vector<16x128xf32>
    %5 = arith.truncf %4 : vector<16x128xf32> to vector<16x128xbf16>
    %c0_4 = arith.constant 0 : index
    %c0_5 = arith.constant 0 : index
    %6 = vector.load %arg4[%c0_4, %c0_5] : memref<128x32xbf16, #tpu.memory_space<vmem>>, vector<128x32xbf16>
    %cst = arith.constant dense<0.000000e+00> : vector<16x32xf32>
    %7 = tpu.matmul %5, %6, %cst {dimension_numbers = #tpu.dot_dimension_numbers<[1], [0], [0], [1], [0, 0, 1, 1], [], []>} : vector<16x128xbf16>, vector<128x32xbf16>, vector<16x32xf32> -> vector<16x32xf32>
    %8 = arith.addf %3, %7 : vector<16x32xf32>
    %c0_6 = arith.constant 0 : index
    %c0_7 = arith.constant 0 : index
    %9 = vector.load %arg8[%c0_6, %c0_7] : memref<16x32xf32, #tpu.memory_space<vmem>>, vector<16x32xf32>
    tpu.vector_store %arg8[%c0_6, %c0_7], %8 {strides = array<i32>} : memref<16x32xf32, #tpu.memory_space<vmem>>, vector<16x32xf32>,
    %c0_i32_8 = arith.constant 0 : i32
    %10 = arith.cmpi eq, %arg2, %c0_i32_8 : i32
    %11 = arith.extui %10 : i1 to i32
    %c0_i32_9 = arith.constant 0 : i32
    %12 = arith.cmpi ne, %11, %c0_i32_9 : i32
    scf.if %12 {
      %c0_10 = arith.constant 0 : index
      %c0_11 = arith.constant 0 : index
      %13 = vector.load %arg8[%c0_10, %c0_11] : memref<16x32xf32, #tpu.memory_space<vmem>>, vector<16x32xf32>
      %c0_12 = arith.constant 0 : index
      %c0_13 = arith.constant 0 : index
      %14 = vector.load %arg5[%c0_12, %c0_13] : memref<1x32xf32, #tpu.memory_space<vmem>>, vector<1x32xf32>
      %15 = vector.broadcast %14 : vector<1x32xf32> to vector<16x32xf32>
      %16 = arith.addf %13, %15 : vector<16x32xf32>
      %c0_14 = arith.constant 0 : index
      %c0_15 = arith.constant 0 : index
      %17 = vector.load %arg6[%c0_14, %c0_15] : memref<16x32xf32, #tpu.memory_space<vmem>>, vector<16x32xf32>
      %18 = arith.addf %16, %17 : vector<16x32xf32>
      %c0_16 = arith.constant 0 : index
      %c0_17 = arith.constant 0 : index
      %19 = vector.load %arg7[%c0_16, %c0_17] : memref<16x32xf32, #tpu.memory_space<vmem>>, vector<16x32xf32>
      tpu.vector_store %arg7[%c0_16, %c0_17], %18 {strides = array<i32>} : memref<16x32xf32, #tpu.memory_space<vmem>>, vector<16x32xf32>,
    } else {
    }
    return
  }
  func.func @transform_0(%arg0: i32, %arg1: i32, %arg2: i32) -> (i32, i32) {
    %c0_i32 = arith.constant 0 : i32
    return %arg0, %arg2 : i32, i32
  }
  func.func @transform_1(%arg0: i32, %arg1: i32, %arg2: i32) -> (i32, i32) {
    %c0_i32 = arith.constant 0 : i32
    return %arg2, %arg1 : i32, i32
  }
  func.func @transform_2(%arg0: i32, %arg1: i32, %arg2: i32) -> (i32, i32) {
    %c0_i32 = arith.constant 0 : i32
    %c0_i32_0 = arith.constant 0 : i32
    return %c0_i32, %arg1 : i32, i32
  }
  func.func @transform_3(%arg0: i32, %arg1: i32, %arg2: i32) -> (i32, i32) {
    %c0_i32 = arith.constant 0 : i32
    return %arg0, %arg1 : i32, i32
  }
  func.func @transform_4(%arg0: i32, %arg1: i32, %arg2: i32) -> (i32, i32) {
    %c0_i32 = arith.constant 0 : i32
    return %arg0, %arg1 : i32, i32
  }
}

module attributes {stable_mosaic.version = 11 : i64} {
  func.func @_ln_matmul_kernel(%arg0: i32, %arg1: i32, %arg2: memref<16x32xf32, #tpu.memory_space<vmem>>, %arg3: memref<1x32xf32, #tpu.memory_space<vmem>>, %arg4: memref<1x32xf32, #tpu.memory_space<vmem>>, %arg5: memref<32x128xbf16, #tpu.memory_space<vmem>>, %arg6: memref<1x128xf32, #tpu.memory_space<vmem>>, %arg7: memref<16x128xf32, #tpu.memory_space<vmem>>) attributes {dimension_semantics = [#tpu.dimension_semantics<parallel>, #tpu.dimension_semantics<parallel>], iteration_bounds = array<i64: 1, 1>, scalar_prefetch = 0 : i64, scratch_operands = 0 : i64, tpu.core_type = #tpu.core_type<tc>, window_params = [{transform_indices = @transform_0, window_bounds = array<i64: 16, 32>}, {pipeline_mode = #tpu.pipeline_mode<synchronous>, transform_indices = @transform_1, window_bounds = array<i64: 1, 32>}, {pipeline_mode = #tpu.pipeline_mode<synchronous>, transform_indices = @transform_2, window_bounds = array<i64: 1, 32>}, {transform_indices = @transform_3, window_bounds = array<i64: 32, 128>}, {transform_indices = @transform_4, window_bounds = array<i64: 1, 128>}, {transform_indices = @transform_5, window_bounds = array<i64: 16, 128>}]} {
    %c0 = arith.constant 0 : index
    %c0_0 = arith.constant 0 : index
    %0 = vector.load %arg2[%c0, %c0_0] : memref<16x32xf32, #tpu.memory_space<vmem>>, vector<16x32xf32>
    %cst = arith.constant dense<0.000000e+00> : vector<16xf32>
    %1 = vector.multi_reduction <add>, %0, %cst [1] : vector<16x32xf32> to vector<16xf32>
    %2 = vector.shape_cast %1 : vector<16xf32> to vector<16x1xf32>
    %cst_1 = arith.constant 3.200000e+01 : f32
    %3 = vector.broadcast %cst_1 : f32 to vector<16x1xf32>
    %4 = arith.divf %2, %3 : vector<16x1xf32>
    %5 = vector.broadcast %4 : vector<16x1xf32> to vector<16x32xf32>
    %6 = arith.subf %0, %5 : vector<16x32xf32>
    %7 = arith.mulf %6, %6 : vector<16x32xf32>
    %cst_2 = arith.constant dense<0.000000e+00> : vector<16xf32>
    %8 = vector.multi_reduction <add>, %7, %cst_2 [1] : vector<16x32xf32> to vector<16xf32>
    %9 = vector.shape_cast %8 : vector<16xf32> to vector<16x1xf32>
    %cst_3 = arith.constant 3.200000e+01 : f32
    %10 = vector.broadcast %cst_3 : f32 to vector<16x1xf32>
    %11 = arith.divf %9, %10 : vector<16x1xf32>
    %12 = vector.broadcast %4 : vector<16x1xf32> to vector<16x32xf32>
    %13 = arith.subf %0, %12 : vector<16x32xf32>
    %cst_4 = arith.constant 9.99999974E-6 : f32
    %14 = vector.broadcast %cst_4 : f32 to vector<16x1xf32>
    %15 = arith.addf %11, %14 : vector<16x1xf32>
    %16 = math.rsqrt %15 : vector<16x1xf32>
    %17 = vector.broadcast %16 : vector<16x1xf32> to vector<16x32xf32>
    %18 = arith.mulf %13, %17 : vector<16x32xf32>
    %c0_5 = arith.constant 0 : index
    %c0_6 = arith.constant 0 : index
    %19 = vector.load %arg3[%c0_5, %c0_6] : memref<1x32xf32, #tpu.memory_space<vmem>>, vector<1x32xf32>
    %20 = vector.broadcast %19 : vector<1x32xf32> to vector<16x32xf32>
    %21 = arith.mulf %18, %20 : vector<16x32xf32>
    %c0_7 = arith.constant 0 : index
    %c0_8 = arith.constant 0 : index
    %22 = vector.load %arg4[%c0_7, %c0_8] : memref<1x32xf32, #tpu.memory_space<vmem>>, vector<1x32xf32>
    %23 = vector.broadcast %22 : vector<1x32xf32> to vector<16x32xf32>
    %24 = arith.addf %21, %23 : vector<16x32xf32>
    %25 = arith.truncf %24 : vector<16x32xf32> to vector<16x32xbf16>
    %c0_9 = arith.constant 0 : index
    %c0_10 = arith.constant 0 : index
    %26 = vector.load %arg5[%c0_9, %c0_10] : memref<32x128xbf16, #tpu.memory_space<vmem>>, vector<32x128xbf16>
    %cst_11 = arith.constant dense<0.000000e+00> : vector<16x128xf32>
    %27 = tpu.matmul %25, %26, %cst_11 {dimension_numbers = #tpu.dot_dimension_numbers<[1], [0], [0], [1], [0, 0, 1, 1], [], []>} : vector<16x32xbf16>, vector<32x128xbf16>, vector<16x128xf32> -> vector<16x128xf32>
    %c0_12 = arith.constant 0 : index
    %c0_13 = arith.constant 0 : index
    %28 = vector.load %arg6[%c0_12, %c0_13] : memref<1x128xf32, #tpu.memory_space<vmem>>, vector<1x128xf32>
    %29 = vector.broadcast %28 : vector<1x128xf32> to vector<16x128xf32>
    %30 = arith.addf %27, %29 : vector<16x128xf32>
    %c0_14 = arith.constant 0 : index
    %c0_15 = arith.constant 0 : index
    %31 = vector.load %arg7[%c0_14, %c0_15] : memref<16x128xf32, #tpu.memory_space<vmem>>, vector<16x128xf32>
    tpu.vector_store %arg7[%c0_14, %c0_15], %30 {strides = array<i32>} : memref<16x128xf32, #tpu.memory_space<vmem>>, vector<16x128xf32>,
    return
  }
  func.func @transform_0(%arg0: i32, %arg1: i32) -> (i32, i32) {
    %c0_i32 = arith.constant 0 : i32
    %c0_i32_0 = arith.constant 0 : i32
    return %arg0, %c0_i32 : i32, i32
  }
  func.func @transform_1(%arg0: i32, %arg1: i32) -> (i32, i32) {
    %c0_i32 = arith.constant 0 : i32
    %c0_i32_0 = arith.constant 0 : i32
    %c0_i32_1 = arith.constant 0 : i32
    return %c0_i32, %c0_i32_0 : i32, i32
  }
  func.func @transform_2(%arg0: i32, %arg1: i32) -> (i32, i32) {
    %c0_i32 = arith.constant 0 : i32
    %c0_i32_0 = arith.constant 0 : i32
    %c0_i32_1 = arith.constant 0 : i32
    return %c0_i32, %c0_i32_0 : i32, i32
  }
  func.func @transform_3(%arg0: i32, %arg1: i32) -> (i32, i32) {
    %c0_i32 = arith.constant 0 : i32
    %c0_i32_0 = arith.constant 0 : i32
    return %c0_i32, %arg1 : i32, i32
  }
  func.func @transform_4(%arg0: i32, %arg1: i32) -> (i32, i32) {
    %c0_i32 = arith.constant 0 : i32
    %c0_i32_0 = arith.constant 0 : i32
    return %c0_i32, %arg1 : i32, i32
  }
  func.func @transform_5(%arg0: i32, %arg1: i32) -> (i32, i32) {
    %c0_i32 = arith.constant 0 : i32
    return %arg0, %arg1 : i32, i32
  }
}

</mosaic_0001>

<bundles_post_ra>
// kernel: gpt_forward.12
= control target key start
LH: loop header
LB: loop body
LE: loop exit
PB: predicated region body
PF: predicated region fallthrough
CT: control target
= control target key end

     0   :  { %s657_s12 = smov 0   ;;  %s659_s13 = smov 0   ;;  %s714_s0 = inlined_call_operand.vmem [shape: f32[8,8,8], index: 0, kind: input, shape index: {}]   ;;  %s715_s1 = inlined_call_operand.vmem [shape: f32[8,8,8], index: 1, kind: input, shape index: {}]   ;;  %s716_s2 = inlined_call_operand.vmem [shape: f32[8,8,8], index: 2, kind: input, shape index: {}]   ;;  %s717_s3 = inlined_call_operand.vmem [shape: f32[8,8,8], index: 3, kind: output, shape index: {}]  }
   0x1   :  { %s661_s14 = smov 0  }
   0x2 LB: > { %s32_s15 = sadd.s32 1, %s627_s13  ;;  %p548_p0 = scmp.ge.s32.totalorder %s631_s14, 1  ;;  %s631_s14 = sphi %s661_s14, %s13_s14   ;;  %s627_s13 = sphi %s659_s13, %s719_s13   ;;  %s623_s12 = sphi %s657_s12, %s718_s12  }
   0x3   : > { %p34_p1 = scmp.ge.s32.totalorder %s32_s15, 8  ;;  %p190_p2 = scmp.lt.s32.totalorder %s631_s14, 9 }
   0x5   : > { %s721_s15 = smov (%p34_p1, %s32_s15), 0  ;;  %p191_p3 = pnand %p548_p0, %p190_p2 }
   0x6   : > { %p232_p4 = scmp.lt.s32.totalorder (!%p191_p3), %s623_s12, 7 }
   0x7   : > { %194 = sbr.rel (%p191_p3) target bundleno = 793 (0x319), region = 32 }
   0xc   : > { %vm268_vm0 = vcmask 64512   ;;  %v633_v0 = vmov 0.0   ;;  %vm634_vm1 = vmmov 0   ;;  %s723_s12 = smov (!%p232_p4, %s623_s12), 7  ;;  %vm265_vm2 = vcmask 7168  }
   0xd   : > { %561 = vmatprep.subr.bf16.mxu0 %v633_v0  ;;  %269 = vst.msk [vmem:[#allocation4] sm:$0xff] %vm268_vm0, %v633_v0  ;;  %563 = vmatprep.mubr.msk.bf16.mxu0 %vm634_vm1, %v633_v0  ;;  %s676_s16 = sshll.u32 %s723_s12, 3  ;;  %v635_v7 = vmov -inf   ;;  %v329_v8 = vlaneseq  ;;  %v636_v17 = vmov 0   ;;  %vm376_vm4 = vcmask 1043456  }
   0xe   : > { %567 = vmatprep.subr.bf16.mxu1 %v633_v0  ;;  %569 = vmatprep.mubr.msk.bf16.mxu1 %vm634_vm1, %v633_v0  ;;  %s245_s19 = scalar_lea.vmem %s715_s1, %s676_s16  ;;  %s238_s22 = scalar_lea.vmem %s714_s0, %s676_s16  ;;  %266 = vst.msk [vmem:[#allocation2] sm:$0xff] %vm265_vm2, %v635_v7  ;;  %267 = vst.msk [vmem:[#allocation3] sm:$0xff] %vm265_vm2, %v633_v0 }
   0xf   : > { %v280_v1 = vld [vmem:[%s245_s19] sm:$0xff]  ;;  %v330_v9 = vshrl.u32 %v329_v8, 7  ;;  %v334_v10 = vand.u32 127, %v329_v8  ;;  %601 = vset.pattern.permute.xlu0 %v636_v17  ;;  %602 = vset.pattern.permute.xlu1 %v636_v17  ;;  %s252_s25 = scalar_lea.vmem %s716_s2, %s676_s16  ;;  %s259_s28 = scalar_lea.vmem %s717_s3, %s676_s16 }
  0x10   : > { %v277_v2 = vld [vmem:[%s238_s22] sm:$0xff]  ;;  %v281_v3 = vpack.c.bf16 %v280_v1, %v280_v1 }
  0x11   : > { %v278_v5 = vmul.f32 0.35355338, %v277_v2  ;;  %vm337_vm3 = vcmp.le.s32.totalorder %v334_v10, %v330_v9  ;;  %v371_v22 = vld [vmem:[%s252_s25] sm:$0xff] }
  0x12   : > { %v287_v4 = vsel %vm268_vm0, %v281_v3, 0  ;;  %v372_v23 = vpack.c.bf16 %v371_v22, %v371_v22 }
  0x13   : > { %562 = vmatpush3.bf16.xpose.msra.mxu0 %v287_v4  ;;  %v279_v6 = vpack.c.bf16 %v278_v5, %v278_v5 }
  0x14   : > { %v378_v24 = vsel %vm376_vm4, %v372_v23, 0  ;;  %v363_v39 = vld [vmem:[#allocation4] sm:$0xff] }
  0x15   : > { %v339_v18 = vld [vmem:[#allocation2] sm:$0xff]  ;;  %568 = vmatpush3.bf16.msra.mxu1 %v378_v24  ;;  %v355_v33 = vld [vmem:[#allocation3] sm:$0xff] }
  0x1a   : > { %564 = vmatmul.mubr.msk.bf16.vlgmr.msra.gmra.mxu0 %vm268_vm0, %v279_v6 }
  0xda   : > { %v323_v11 = vpop.f32.mrf.mxu0 }
  0xdb   : > { %v338_v12 = vsel %vm337_vm3, %v323_v11, -inf }
  0xdc   : > { %v565_v13 = vpop.f32.mrf.mxu0  ;;  %v340_v14 = vsel %vm268_vm0, %v338_v12, -inf }
  0xdd   : > { %341 = vmax.xlane.f32.xlu0 %v340_v14 }
  0xde   : > { %v326_v15 = vpop.f32.mrf.mxu0 }
  0xe0   : > { %v566_v16 = vpop.f32.mrf.mxu0 }
 0x166   : > { %v342_v19 = vpop.xlane.xlu0 %341 }
 0x167   : > { %v343_v20 = vmax.f32 %v339_v18, %v342_v19 }
 0x169   : > { %v344_v21 = vsub.f32 %v339_v18, %v343_v20  ;;  %422 = vst.msk [vmem:[#allocation2] sm:$0xff] %vm265_vm2, %v343_v20  ;;  %349 = vperm.xlu0 %601, %v343_v20  }
 0x16b   : > { %v345_v29 = vmul.f32 1.442695, %v344_v21 }
 0x1e4   : > { %v350_v25 = vpop.permute.xlu0 %349 }
 0x1e5   : > { %v352_v26 = vsub.f32 %v338_v12, %v350_v25 }
 0x1e7   : > { %v353_v27 = vmul.f32 1.442695, %v352_v26 }
 0x1e9   : > { %603 = vpow2.f32 %v353_v27 }
 0x1ea   : > { %605 = vpow2.f32 %v345_v29 }
 0x1f6   : > { %v604_v28 = vpop.eup %603 }
 0x1f7   : > { %v357_v30 = vsel %vm268_vm0, %v604_v28, 0.0  ;;  %v370_v31 = vpack.c.bf16 %v604_v28, %v604_v28  ;;  %v606_v32 = vpop.eup %605 }
 0x1f8   : > { %358 = vadd.xlane.f32.xlu1 %v357_v30  ;;  %v356_v34 = vmul.f32 %v606_v32, %v355_v33 }
 0x1f9   : > { %570 = vmatmul.mubr.msk.bf16.vlgmr.msra.gmra.mxu1 %vm268_vm0, %v370_v31 }
 0x209   : > { %366 = vperm.xlu1 %602, %v606_v32  }
 0x281   : > { %v359_v35 = vpop.xlane.xlu1 %358 }
 0x282   : > { %v360_v36 = vadd.f32 %v359_v35, %v356_v34 }
 0x284   : > { %362 = vst.msk [vmem:[#allocation3] sm:$0xff] %vm265_vm2, %v360_v36 }
 0x285   : > { %v367_v40 = vpop.permute.xlu1 %366 }
 0x286   : > { %v369_v41 = vmul.f32 %v367_v40, %v363_v39 }
 0x28b   : > { %v426_v37 = vld [vmem:[#allocation3] sm:$0xff] }
 0x28c   : > { %607 = vrcp.f32 %v426_v37 }
 0x299   : > { %v608_v38 = vpop.eup %607 }
 0x29a   : > { %431 = vperm.xlu1 %602, %v608_v38  }
 0x2b9   : > { %v414_v42 = vpop.f32.mrf.mxu1 }
 0x2ba   : > { %v420_v43 = vadd.f32 %v414_v42, %v369_v41 }
 0x2bb   : > { %v571_v44 = vpop.f32.mrf.mxu1 }
 0x2bc   : > { %421 = vst.msk [vmem:[#allocation4] sm:$0xff] %vm268_vm0, %v420_v43 }
 0x2bd   : > { %v417_v45 = vpop.f32.mrf.mxu1 }
 0x2bf   : > { %v572_v46 = vpop.f32.mrf.mxu1 }
 0x2c3   : > { %v428_v47 = vld [vmem:[#allocation4] sm:$0xff] }
 0x315   : > { %v432_v48 = vpop.permute.xlu1 %431 }
 0x316   : > { %v434_v49 = vmul.f32 %v432_v48, %v428_v47 }
 0x318   : > { %436 = vst.msk [vmem:[%s259_s28] sm:$0xff] %vm268_vm0, %v434_v49 }
 0x319 PF: > { %s13_s14 = sadd.s32 1, %s631_s14   ;;  %s718_s12 = smov %s627_s13 }
 0x31a   : > { %p10_p5 = scmp.ge.s32.totalorder %s13_s14, 10   ;;  %s719_s13 = smov %s721_s15 }
 0x31c   :  { %12 = sbr.rel (!%p10_p5) target bundleno = 2 (0x2), region = 80 }

// kernel: gpt_forward.13
= control target key start
LH: loop header
LB: loop body
LE: loop exit
PB: predicated region body
PF: predicated region fallthrough
CT: control target
= control target key end

     0   :  { %vm22_vm0 = vcmask 261120   ;;  %v138_v0 = vmov 0.0   ;;  %vm139_vm1 = vmmov 0   ;;  %s199_s1 = inlined_call_operand.vmem [shape: bf16[32,32], index: 1, kind: input, shape index: {}]   ;;  %s200_s0 = inlined_call_operand.vmem [shape: f32[16,32], index: 0, kind: input, shape index: {}]   ;;  %s201_s2 = inlined_call_operand.vmem [shape: f32[1,32], index: 2, kind: input, shape index: {}]   ;;  %s202_s3 = inlined_call_operand.vmem [shape: f32[16,32], index: 3, kind: input, shape index: {}]   ;;  %s203_s4 = inlined_call_operand.vmem [shape: f32[16,32], index: 4, kind: output, shape index: {}]  }
   0x1   :  { %126 = vmatprep.subr.bf16.mxu0 %v138_v0  ;;  %v136_v1 = vld [vmem:[%s199_s1 + $0x8] sm:$0xff]   ;;  %130 = vmatprep.mubr.msk.bf16.mxu0 %vm139_vm1, %v138_v0  ;;  %23 = vst.msk [vmem:[#allocation2] sm:$0xff] %vm22_vm0, %v138_v0  ;;  %24 = vst.msk [vmem:[#allocation2 + $0x8] sm:$0xff] %vm22_vm0, %v138_v0  ;;  %v137_v2 = vld [vmem:[%s199_s1] sm:$0xff]  }
   0x2   :  { %127 = vmatpush3.bf16.msra.mxu0 %v136_v1  ;;  %v27_v3 = vld [vmem:[%s200_s0] sm:$0xff]  ;;  %v28_v4 = vld [vmem:[%s200_s0 + $0x8] sm:$0xff] }
   0x3   :  { %128 = vmatprep.subr.bf16.mxu0 %v138_v0  ;;  %v29_v5 = vpack.c.bf16 %v28_v4, %v27_v3  ;;  %v122_v14 = vld [vmem:[%s201_s2] ss:$0 sm:$0xff]  ;;  %v110_v20 = vld [vmem:[%s202_s3 + $0x8] sm:$0xff] }
   0x4   :  { %v109_v16 = vld [vmem:[%s202_s3] sm:$0xff] }
   0x6   :  { %129 = vmatpush3.bf16.msra.mxu0 %v137_v2 }
   0x8   :  { %v25_v6 = vld [vmem:[#allocation2] sm:$0xff]  ;;  %v26_v10 = vld [vmem:[#allocation2 + $0x8] sm:$0xff] }
   0x9   :  { %131 = vmatmul.mubr.msk.bf16.vlgmr.msra.gmra.mxu0 %vm22_vm0, %v29_v5 }
  0xc9   :  { %v84_v7 = vpop.f32.mrf.mxu0 }
  0xca   :  { %v91_v8 = vadd.f32 %v84_v7, %v25_v6 }
  0xcb   :  { %v132_v9 = vpop.f32.mrf.mxu0 }
  0xcc   :  { %93 = vst.msk [vmem:[#allocation2] sm:$0xff] %vm22_vm0, %v91_v8 }
  0xcd   :  { %v87_v11 = vpop.f32.mrf.mxu0 }
  0xce   :  { %v92_v12 = vadd.f32 %v87_v11, %v26_v10 }
  0xcf   :  { %v133_v13 = vpop.f32.mrf.mxu0 }
  0xd0   :  { %94 = vst.msk [vmem:[#allocation2 + $0x8] sm:$0xff] %vm22_vm0, %v92_v12 }
  0xd3   :  { %v98_v15 = vld [vmem:[#allocation2] sm:$0xff] }
  0xd4   :  { %v107_v17 = vadd.f32 %v122_v14, %v98_v15 }
  0xd6   :  { %v111_v18 = vadd.f32 %v109_v16, %v107_v17 }
  0xd7   :  { %v99_v19 = vld [vmem:[#allocation2 + $0x8] sm:$0xff] }
  0xd8   :  { %113 = vst.msk [vmem:[%s203_s4] sm:$0xff] %vm22_vm0, %v111_v18  ;;  %v108_v21 = vadd.f32 %v122_v14, %v99_v19 }
  0xda   :  { %v112_v22 = vadd.f32 %v110_v20, %v108_v21 }
  0xdc   :  { %114 = vst.msk [vmem:[%s203_s4 + $0x8] sm:$0xff] %vm22_vm0, %v112_v22 }

// kernel: gpt_forward.11
= control target key start
LH: loop header
LB: loop body
LE: loop exit
PB: predicated region body
PF: predicated region fallthrough
CT: control target
= control target key end

     0   :  { %vm23_vm0 = vcmask 261120   ;;  %v169_v14 = vmov 0.0   ;;  %vm170_vm1 = vmmov 0   ;;  %vm137_vm2 = vcmask 785408   ;;  %s233_s0 = inlined_call_operand.vmem [shape: f32[16,32], index: 0, kind: input, shape index: {}]   ;;  %s234_s3 = inlined_call_operand.vmem [shape: bf16[32,96], index: 3, kind: input, shape index: {}]   ;;  %s235_s1 = inlined_call_operand.vmem [shape: f32[1,32], index: 1, kind: input, shape index: {}]   ;;  %s236_s2 = inlined_call_operand.vmem [shape: f32[1,32], index: 2, kind: input, shape index: {}]   ;;  %s237_s4 = inlined_call_operand.vmem [shape: f32[1,96], index: 4, kind: input, shape index: {}]   ;;  %s238_s5 = inlined_call_operand.vmem [shape: f32[16,96], index: 5, kind: output, shape index: {}]  }
   0x1   :  { %v21_v0 = vld [vmem:[%s233_s0] sm:$0xff]  ;;  %v22_v1 = vld [vmem:[%s233_s0 + $0x8] sm:$0xff]  ;;  %153 = vmatprep.subr.bf16.mxu0 %v169_v14  ;;  %157 = vmatprep.mubr.msk.bf16.mxu0 %vm170_vm1, %v169_v14 }
   0x2   :  { %v24_v2 = vsel %vm23_vm0, %v21_v0, 0.0  ;;  %v27_v3 = vsel %vm23_vm0, %v22_v1, 0.0  ;;  %v163_v15 = vld [vmem:[%s234_s3 + $0x8] sm:$0xff]   ;;  %v164_v16 = vld [vmem:[%s234_s3] sm:$0xff]  }
   0x3   :  { %25 = vadd.xlane.f32.xlu0 %v24_v2  ;;  %154 = vmatpush3.bf16.msra.mxu0 %v163_v15  ;;  %v144_v25 = vld [vmem:[%s235_s1] ss:$0 sm:$0xff] }
   0x4   :  { %155 = vmatprep.subr.bf16.mxu0 %v169_v14  ;;  %v145_v29 = vld [vmem:[%s236_s2] ss:$0 sm:$0xff] }
   0x5   :  { %v146_v34 = vld [vmem:[%s237_s4] ss:$0 sm:$0xff] }
   0x7   :  { %28 = vadd.xlane.f32.xlu0 %v27_v3  ;;  %156 = vmatpush3.bf16.msra.mxu0 %v164_v16 }
  0x8c   :  { %v26_v4 = vpop.xlane.xlu0 %25 }
  0x8d   :  { %v31_v5 = vmul.f32 0.03125, %v26_v4 }
  0x8f   :  { %v33_v6 = vsub.f32 %v21_v0, %v31_v5 }
  0x90   :  { %v29_v7 = vpop.xlane.xlu0 %28 }
  0x91   :  { %v32_v8 = vmul.f32 0.03125, %v29_v7  ;;  %v35_v9 = vmul.f32 %v33_v6, %v33_v6 }
  0x93   :  { %v34_v10 = vsub.f32 %v22_v1, %v32_v8  ;;  %v37_v11 = vsel %vm23_vm0, %v35_v9, 0.0 }
  0x94   :  { %38 = vadd.xlane.f32.xlu1 %v37_v11 }
  0x95   :  { %v36_v12 = vmul.f32 %v34_v10, %v34_v10 }
  0x97   :  { %v40_v13 = vsel %vm23_vm0, %v36_v12, 0.0 }
  0x98   :  { %41 = vadd.xlane.f32.xlu1 %v40_v13 }
 0x11d   :  { %v39_v17 = vpop.xlane.xlu1 %38 }
 0x11e   :  { %v43_v18 = vmul.f32 0.03125, %v39_v17 }
 0x120   :  { %v45_v19 = vadd.f32 1e-05, %v43_v18 }
 0x121   :  { %v42_v20 = vpop.xlane.xlu1 %41 }
 0x122   :  { %165 = vrsqrt.f32 %v45_v19  ;;  %v44_v21 = vmul.f32 0.03125, %v42_v20 }
 0x124   :  { %v46_v22 = vadd.f32 1e-05, %v44_v21 }
 0x126   :  { %167 = vrsqrt.f32 %v46_v22 }
 0x12f   :  { %v166_v23 = vpop.eup %165 }
 0x130   :  { %v49_v24 = vmul.f32 %v166_v23, %v33_v6 }
 0x132   :  { %v58_v28 = vmul.f32 %v144_v25, %v49_v24 }
 0x133   :  { %v168_v26 = vpop.eup %167 }
 0x134   :  { %v50_v27 = vmul.f32 %v168_v26, %v34_v10  ;;  %v67_v31 = vadd.f32 %v145_v29, %v58_v28 }
 0x136   :  { %v59_v30 = vmul.f32 %v144_v25, %v50_v27 }
 0x138   :  { %v68_v32 = vadd.f32 %v145_v29, %v59_v30 }
 0x13a   :  { %v69_v33 = vpack.c.bf16 %v68_v32, %v67_v31 }
 0x13c   :  { %158 = vmatmul.mubr.msk.bf16.vlgmr.msra.gmra.mxu0 %vm23_vm0, %v69_v33 }
 0x1fc   :  { %v130_v35 = vpop.f32.mrf.mxu0 }
 0x1fd   :  { %v131_v36 = vadd.f32 %v146_v34, %v130_v35 }
 0x1fe   :  { %v159_v37 = vpop.f32.mrf.mxu0 }
 0x1ff   :  { %138 = vst.msk [vmem:[%s238_s5] sm:$0xff] %vm137_vm2, %v131_v36 }
 0x200   :  { %v133_v38 = vpop.f32.mrf.mxu0 }
 0x201   :  { %v134_v39 = vadd.f32 %v146_v34, %v133_v38 }
 0x202   :  { %v160_v40 = vpop.f32.mrf.mxu0 }
 0x203   :  { %139 = vst.msk [vmem:[%s238_s5 + $0x8] sm:$0xff] %vm137_vm2, %v134_v39 }

// kernel: gpt_forward.14
= control target key start
LH: loop header
LB: loop body
LE: loop exit
PB: predicated region body
PF: predicated region fallthrough
CT: control target
= control target key end

     0   :  { %vm23_vm0 = vcmask 261120   ;;  %v190_v14 = vmov 0.0   ;;  %vm191_vm1 = vmmov 0   ;;  %s254_s0 = inlined_call_operand.vmem [shape: f32[16,32], index: 0, kind: input, shape index: {}]   ;;  %s255_s3 = inlined_call_operand.vmem [shape: bf16[32,128], index: 3, kind: input, shape index: {}]   ;;  %s256_s1 = inlined_call_operand.vmem [shape: f32[1,32], index: 1, kind: input, shape index: {}]   ;;  %s257_s2 = inlined_call_operand.vmem [shape: f32[1,32], index: 2, kind: input, shape index: {}]   ;;  %s258_s4 = inlined_call_operand.vmem [shape: f32[1,128], index: 4, kind: input, shape index: {}]   ;;  %s259_s5 = inlined_call_operand.vmem [shape: f32[16,128], index: 5, kind: output, shape index: {}]  }
   0x1   :  { %v21_v0 = vld [vmem:[%s254_s0] sm:$0xff]  ;;  %v22_v1 = vld [vmem:[%s254_s0 + $0x8] sm:$0xff]  ;;  %170 = vmatprep.subr.bf16.mxu0 %v190_v14  ;;  %174 = vmatprep.mubr.msk.bf16.mxu0 %vm191_vm1, %v190_v14 }
   0x2   :  { %v24_v2 = vsel %vm23_vm0, %v21_v0, 0.0  ;;  %v27_v3 = vsel %vm23_vm0, %v22_v1, 0.0  ;;  %v180_v15 = vld [vmem:[%s255_s3 + $0x8] sm:$0xff]   ;;  %v181_v16 = vld [vmem:[%s255_s3] sm:$0xff]  }
   0x3   :  { %25 = vadd.xlane.f32.xlu0 %v24_v2  ;;  %171 = vmatpush3.bf16.msra.mxu0 %v180_v15  ;;  %v161_v25 = vld [vmem:[%s256_s1] ss:$0 sm:$0xff] }
   0x4   :  { %172 = vmatprep.subr.bf16.mxu0 %v190_v14  ;;  %v162_v29 = vld [vmem:[%s257_s2] ss:$0 sm:$0xff] }
   0x5   :  { %v163_v34 = vld [vmem:[%s258_s4] ss:$0 sm:$0xff] }
   0x7   :  { %28 = vadd.xlane.f32.xlu0 %v27_v3  ;;  %173 = vmatpush3.bf16.msra.mxu0 %v181_v16 }
  0x8c   :  { %v26_v4 = vpop.xlane.xlu0 %25 }
  0x8d   :  { %v31_v5 = vmul.f32 0.03125, %v26_v4 }
  0x8f   :  { %v33_v6 = vsub.f32 %v21_v0, %v31_v5 }
  0x90   :  { %v29_v7 = vpop.xlane.xlu0 %28 }
  0x91   :  { %v32_v8 = vmul.f32 0.03125, %v29_v7  ;;  %v35_v9 = vmul.f32 %v33_v6, %v33_v6 }
  0x93   :  { %v34_v10 = vsub.f32 %v22_v1, %v32_v8  ;;  %v37_v11 = vsel %vm23_vm0, %v35_v9, 0.0 }
  0x94   :  { %38 = vadd.xlane.f32.xlu1 %v37_v11 }
  0x95   :  { %v36_v12 = vmul.f32 %v34_v10, %v34_v10 }
  0x97   :  { %v40_v13 = vsel %vm23_vm0, %v36_v12, 0.0 }
  0x98   :  { %41 = vadd.xlane.f32.xlu1 %v40_v13 }
 0x11d   :  { %v39_v17 = vpop.xlane.xlu1 %38 }
 0x11e   :  { %v43_v18 = vmul.f32 0.03125, %v39_v17 }
 0x120   :  { %v45_v19 = vadd.f32 1e-05, %v43_v18 }
 0x121   :  { %v42_v20 = vpop.xlane.xlu1 %41 }
 0x122   :  { %182 = vrsqrt.f32 %v45_v19  ;;  %v44_v21 = vmul.f32 0.03125, %v42_v20 }
 0x124   :  { %v46_v22 = vadd.f32 1e-05, %v44_v21 }
 0x126   :  { %184 = vrsqrt.f32 %v46_v22 }
 0x12f   :  { %v183_v23 = vpop.eup %182 }
 0x130   :  { %v49_v24 = vmul.f32 %v183_v23, %v33_v6 }
 0x132   :  { %v58_v28 = vmul.f32 %v161_v25, %v49_v24 }
 0x133   :  { %v185_v26 = vpop.eup %184 }
 0x134   :  { %v50_v27 = vmul.f32 %v185_v26, %v34_v10  ;;  %v67_v31 = vadd.f32 %v162_v29, %v58_v28 }
 0x136   :  { %v59_v30 = vmul.f32 %v161_v25, %v50_v27 }
 0x138   :  { %v68_v32 = vadd.f32 %v162_v29, %v59_v30 }
 0x13a   :  { %v69_v33 = vpack.c.bf16 %v68_v32, %v67_v31 }
 0x13c   :  { %175 = vmatmul.mubr.msk.bf16.vlgmr.msra.gmra.mxu0 %vm23_vm0, %v69_v33 }
 0x1fc   :  { %v130_v35 = vpop.f32.mrf.mxu0 }
 0x1fd   :  { %v131_v36 = vadd.f32 %v163_v34, %v130_v35 }
 0x1fe   :  { %v176_v37 = vpop.f32.mrf.mxu0 }
 0x1ff   :  { %v139_v38 = vmul.f32 0.044715, %v131_v36  ;;  %v137_v52 = vmul.f32 0.5, %v131_v36 }
 0x200   :  { %v133_v39 = vpop.f32.mrf.mxu0 }
 0x201   :  { %v141_v40 = vmul.f32 %v139_v38, %v131_v36  ;;  %v134_v41 = vadd.f32 %v163_v34, %v133_v39 }
 0x202   :  { %v177_v42 = vpop.f32.mrf.mxu0 }
 0x203   :  { %v143_v43 = vmul.f32 %v141_v40, %v131_v36  ;;  %v140_v44 = vmul.f32 0.044715, %v134_v41  ;;  %v138_v56 = vmul.f32 0.5, %v134_v41 }
 0x205   :  { %v145_v45 = vadd.f32 %v143_v43, %v131_v36  ;;  %v142_v46 = vmul.f32 %v140_v44, %v134_v41 }
 0x207   :  { %v147_v47 = vmul.f32 0.7978846, %v145_v45  ;;  %v144_v48 = vmul.f32 %v142_v46, %v134_v41 }
 0x209   :  { %186 = vtanh.f32 %v147_v47  ;;  %v146_v49 = vadd.f32 %v144_v48, %v134_v41 }
 0x20b   :  { %v148_v50 = vmul.f32 0.7978846, %v146_v49 }
 0x20d   :  { %188 = vtanh.f32 %v148_v50 }
 0x216   :  { %v187_v51 = vpop.eup %186 }
 0x217   :  { %v151_v53 = vadd.f32 1.0, %v187_v51 }
 0x219   :  { %v153_v54 = vmul.f32 %v151_v53, %v137_v52 }
 0x21a   :  { %v189_v55 = vpop.eup %188 }
 0x21b   :  { %155 = vst [vmem:[%s259_s5] sm:$0xff] %v153_v54  ;;  %v152_v57 = vadd.f32 1.0, %v189_v55 }
 0x21d   :  { %v154_v58 = vmul.f32 %v152_v57, %v138_v56 }
 0x21f   :  { %156 = vst [vmem:[%s259_s5 + $0x8] sm:$0xff] %v154_v58 }

// kernel: gpt_forward.15
= control target key start
LH: loop header
LB: loop body
LE: loop exit
PB: predicated region body
PF: predicated region fallthrough
CT: control target
= control target key end

     0   :  { %vm22_vm0 = vcmask 261120   ;;  %v212_v0 = vmov 0.0   ;;  %vm213_vm1 = vmmov 0   ;;  %s290_s1 = inlined_call_operand.vmem [shape: bf16[128,32], index: 1, kind: input, shape index: {}]   ;;  %s291_s0 = inlined_call_operand.vmem [shape: f32[16,128], index: 0, kind: input, shape index: {}]   ;;  %s292_s2 = inlined_call_operand.vmem [shape: f32[1,32], index: 2, kind: input, shape index: {}]   ;;  %s293_s3 = inlined_call_operand.vmem [shape: f32[16,32], index: 3, kind: input, shape index: {}]   ;;  %s294_s4 = inlined_call_operand.vmem [shape: f32[16,32], index: 4, kind: output, shape index: {}]  }
   0x1   :  { %182 = vmatprep.subr.bf16.mxu0 %v212_v0  ;;  %v204_v1 = vld [vmem:[%s290_s1 + $0x38] sm:$0xff]   ;;  %198 = vmatprep.mubr.msk.bf16.mxu0 %vm213_vm1, %v212_v0  ;;  %23 = vst.msk [vmem:[#allocation2] sm:$0xff] %vm22_vm0, %v212_v0  ;;  %24 = vst.msk [vmem:[#allocation2 + $0x8] sm:$0xff] %vm22_vm0, %v212_v0  ;;  %v205_v2 = vld [vmem:[%s290_s1 + $0x30] sm:$0xff]  }
   0x2   :  { %183 = vmatpush3.bf16.msra.mxu0 %v204_v1  ;;  %v206_v3 = vld [vmem:[%s290_s1 + $0x28] sm:$0xff]   ;;  %v207_v4 = vld [vmem:[%s290_s1 + $0x20] sm:$0xff]   ;;  %v208_v5 = vld [vmem:[%s290_s1 + $0x18] sm:$0xff]  }
   0x3   :  { %184 = vmatprep.subr.bf16.mxu0 %v212_v0  ;;  %v209_v6 = vld [vmem:[%s290_s1 + $0x10] sm:$0xff]   ;;  %v210_v7 = vld [vmem:[%s290_s1 + $0x8] sm:$0xff]   ;;  %v211_v8 = vld [vmem:[%s290_s1] sm:$0xff]  }
   0x4   :  { %v27_v9 = vld [vmem:[%s291_s0] sm:$0xff]  ;;  %v28_v10 = vld [vmem:[%s291_s0 + $0x8] sm:$0xff] }
   0x5   :  { %v29_v11 = vpack.c.bf16 %v28_v10, %v27_v9  ;;  %v172_v20 = vld [vmem:[%s292_s2] ss:$0 sm:$0xff]  ;;  %v155_v25 = vld [vmem:[%s293_s3 + $0x8] sm:$0xff] }
   0x6   :  { %185 = vmatpush3.bf16.msra.mxu0 %v205_v2  ;;  %v154_v22 = vld [vmem:[%s293_s3] sm:$0xff] }
   0x7   :  { %186 = vmatprep.subr.bf16.mxu0 %v212_v0 }
   0x8   :  { %v25_v12 = vld [vmem:[#allocation2] sm:$0xff]  ;;  %v26_v16 = vld [vmem:[#allocation2 + $0x8] sm:$0xff] }
   0xa   :  { %187 = vmatpush3.bf16.msra.mxu0 %v206_v3 }
   0xb   :  { %188 = vmatprep.subr.bf16.mxu0 %v212_v0 }
   0xe   :  { %189 = vmatpush3.bf16.msra.mxu0 %v207_v4 }
   0xf   :  { %190 = vmatprep.subr.bf16.mxu0 %v212_v0 }
  0x12   :  { %191 = vmatpush3.bf16.msra.mxu0 %v208_v5 }
  0x13   :  { %192 = vmatprep.subr.bf16.mxu0 %v212_v0 }
  0x16   :  { %193 = vmatpush3.bf16.msra.mxu0 %v209_v6 }
  0x17   :  { %194 = vmatprep.subr.bf16.mxu0 %v212_v0 }
  0x1a   :  { %195 = vmatpush3.bf16.msra.mxu0 %v210_v7 }
  0x1b   :  { %196 = vmatprep.subr.bf16.mxu0 %v212_v0 }
  0x1e   :  { %197 = vmatpush3.bf16.msra.mxu0 %v211_v8 }
  0x21   :  { %199 = vmatmul.mubr.bf16.vlgmr.msra.gmra.mxu0 %v29_v11 }
  0xe1   :  { %v128_v13 = vpop.f32.mrf.mxu0 }
  0xe2   :  { %v135_v14 = vadd.f32 %v128_v13, %v25_v12 }
  0xe3   :  { %v200_v15 = vpop.f32.mrf.mxu0 }
  0xe4   :  { %138 = vst.msk [vmem:[#allocation2] sm:$0xff] %vm22_vm0, %v135_v14 }
  0xe5   :  { %v131_v17 = vpop.f32.mrf.mxu0 }
  0xe6   :  { %v136_v18 = vadd.f32 %v131_v17, %v26_v16 }
  0xe7   :  { %v201_v19 = vpop.f32.mrf.mxu0 }
  0xe8   :  { %139 = vst.msk [vmem:[#allocation2 + $0x8] sm:$0xff] %vm22_vm0, %v136_v18 }
  0xeb   :  { %v143_v21 = vld [vmem:[#allocation2] sm:$0xff] }
  0xec   :  { %v152_v23 = vadd.f32 %v172_v20, %v143_v21 }
  0xee   :  { %v156_v24 = vadd.f32 %v154_v22, %v152_v23 }
  0xef   :  { %v144_v26 = vld [vmem:[#allocation2 + $0x8] sm:$0xff] }
  0xf0   :  { %158 = vst.msk [vmem:[%s294_s4] sm:$0xff] %vm22_vm0, %v156_v24  ;;  %v153_v27 = vadd.f32 %v172_v20, %v144_v26 }
  0xf2   :  { %v157_v28 = vadd.f32 %v155_v25, %v153_v27 }
  0xf4   :  { %159 = vst.msk [vmem:[%s294_s4 + $0x8] sm:$0xff] %vm22_vm0, %v157_v28 }

// kernel: gpt_forward.21
= control target key start
LH: loop header
LB: loop body
LE: loop exit
PB: predicated region body
PF: predicated region fallthrough
CT: control target
= control target key end

     0   :  { %vm24_vm0 = vcmask 261120   ;;  %s270_s0 = inlined_call_operand.vmem [shape: f32[16,32], index: 0, kind: input, shape index: {}]   ;;  %s271_s1 = inlined_call_operand.vmem [shape: f32[1,32], index: 1, kind: input, shape index: {}]   ;;  %s272_s2 = inlined_call_operand.vmem [shape: f32[1,32], index: 2, kind: input, shape index: {}]   ;;  %s273_s3 = inlined_call_operand.vmem [shape: bf16[32,128], index: 3, kind: input, shape index: {}]   ;;  %s274_s4 = inlined_call_operand.vmem [shape: f32[1,128], index: 4, kind: input, shape index: {}]   ;;  %s275_s5 = inlined_call_operand.hbm [shape: f32[16,128], index: 5, kind: output, shape index: {}]  }
   0x1   :  { %v22_v0 = vld [vmem:[%s270_s0] sm:$0xff]  ;;  %v23_v1 = vld [vmem:[%s270_s0 + $0x8] sm:$0xff] }
   0x2   :  { %v25_v2 = vsel %vm24_vm0, %v22_v0, 0.0 }
   0x3   :  { %26 = vadd.xlane.f32.xlu0 %v25_v2 }
   0x4   :  { %10 = vsyncpa [#allocation3], 0  ;;  %v28_v3 = vsel %vm24_vm0, %v23_v1, 0.0  ;;  %v178_v14 = vld [vmem:[%s273_s3 + $0x8] sm:$0xff]   ;;  %v206_v15 = vmov 0.0   ;;  %vm207_vm1 = vmmov 0  }
   0x5   :  { %165 = vmatprep.subr.bf16.mxu0 %v206_v15  ;;  %169 = vmatprep.mubr.msk.bf16.mxu0 %vm207_vm1, %v206_v15  ;;  %v179_v16 = vld [vmem:[%s273_s3] sm:$0xff]  }
   0x6   :  { %166 = vmatpush3.bf16.msra.mxu0 %v178_v14  ;;  %v156_v25 = vld [vmem:[%s271_s1] ss:$0 sm:$0xff]  ;;  %s208_s1 = smov [#allocation2]  }
   0x7   :  { %29 = vadd.xlane.f32.xlu0 %v28_v3  ;;  %167 = vmatprep.subr.bf16.mxu0 %v206_v15  ;;  %v157_v29 = vld [vmem:[%s272_s2] ss:$0 sm:$0xff]  ;;  %s145_s30 = sshll.u32 %s208_s1, 4  ;;  %s146_s30 = int_to_ptr.vmem [resolvable:$true] %s145_s30 }
   0x8   :  { %v158_v34 = vld [vmem:[%s274_s4] ss:$0 sm:$0xff]  ;;  %s184_s2 = scalar_lea.vmem %s146_s30, 256  ;;  %p189_p1 = scmp.lt.s32.totalorder %s146_s30, %s146_s30 }
   0x9   :  { %p185_p0 = scmp.ne.s32.totalorder %s146_s30, %s184_s2  ;;  %p190_p2 = scmp.lt.s32.totalorder %s184_s2, %s184_s2 }
   0xa   :  { %168 = vmatpush3.bf16.msra.mxu0 %v179_v16 }
   0xb   :  { %p191_p3 = por %p190_p2, %p189_p1 }
   0xd   :  { %p192_p4 = pnand %p191_p3, %p185_p0 }
  0x8c   :  { %v27_v4 = vpop.xlane.xlu0 %26 }
  0x8d   :  { %v32_v5 = vmul.f32 0.03125, %v27_v4 }
  0x8f   :  { %v34_v6 = vsub.f32 %v22_v0, %v32_v5 }
  0x90   :  { %v30_v7 = vpop.xlane.xlu0 %29 }
  0x91   :  { %v33_v8 = vmul.f32 0.03125, %v30_v7  ;;  %v36_v9 = vmul.f32 %v34_v6, %v34_v6 }
  0x93   :  { %v35_v10 = vsub.f32 %v23_v1, %v33_v8  ;;  %v38_v11 = vsel %vm24_vm0, %v36_v9, 0.0 }
  0x94   :  { %39 = vadd.xlane.f32.xlu1 %v38_v11 }
  0x95   :  { %v37_v12 = vmul.f32 %v35_v10, %v35_v10 }
  0x97   :  { %v41_v13 = vsel %vm24_vm0, %v37_v12, 0.0 }
  0x98   :  { %42 = vadd.xlane.f32.xlu1 %v41_v13 }
 0x11d   :  { %v40_v17 = vpop.xlane.xlu1 %39 }
 0x11e   :  { %v44_v18 = vmul.f32 0.03125, %v40_v17 }
 0x120   :  { %v46_v19 = vadd.f32 1e-05, %v44_v18 }
 0x121   :  { %v43_v20 = vpop.xlane.xlu1 %42 }
 0x122   :  { %180 = vrsqrt.f32 %v46_v19  ;;  %v45_v21 = vmul.f32 0.03125, %v43_v20 }
 0x124   :  { %v47_v22 = vadd.f32 1e-05, %v45_v21 }
 0x126   :  { %182 = vrsqrt.f32 %v47_v22 }
 0x12f   :  { %v181_v23 = vpop.eup %180 }
 0x130   :  { %v50_v24 = vmul.f32 %v181_v23, %v34_v6 }
 0x132   :  { %v59_v28 = vmul.f32 %v156_v25, %v50_v24 }
 0x133   :  { %v183_v26 = vpop.eup %182 }
 0x134   :  { %v51_v27 = vmul.f32 %v183_v26, %v35_v10  ;;  %v68_v31 = vadd.f32 %v157_v29, %v59_v28 }
 0x136   :  { %v60_v30 = vmul.f32 %v156_v25, %v51_v27 }
 0x138   :  { %v69_v32 = vadd.f32 %v157_v29, %v60_v30 }
 0x13a   :  { %v70_v33 = vpack.c.bf16 %v69_v32, %v68_v31 }
 0x13c   :  { %170 = vmatmul.mubr.msk.bf16.vlgmr.msra.gmra.mxu0 %vm24_vm0, %v70_v33 }
 0x1fc   :  { %v131_v35 = vpop.f32.mrf.mxu0 }
 0x1fd   :  { %v132_v36 = vadd.f32 %v158_v34, %v131_v35 }
 0x1fe   :  { %v171_v37 = vpop.f32.mrf.mxu0 }
 0x1ff   :  { %138 = vst [vmem:[#allocation2] sm:$0xff] %v132_v36 }
 0x200   :  { %v134_v38 = vpop.f32.mrf.mxu0 }
 0x201   :  { %v135_v39 = vadd.f32 %v158_v34, %v134_v38 }
 0x202   :  { %v172_v40 = vpop.f32.mrf.mxu0 }
 0x203   :  { %139 = vst [vmem:[#allocation2 + $0x8] sm:$0xff] %v135_v39 }
 0x204   :  { %195 = shalt.err (!%p192_p4)
}
 0x205   :  { %s209_s6 = smov 128   ;;  %s210_s4 = smov 8  }
 0x206   :  { %151 = dma.vmem_to_hbm [thread:$0]  %s146_s30, 256, %s275_s5, [#allocation3], %s209_s6, %s209_s6, %s210_s4  }
 0x207   :  { %204 = dma.done.wait [#allocation3], 256  }
 0x208   :  { %205 = vsyncadd [#allocation3], 4294967040 }
 0x209   :  { %155 = vsyncpa [#allocation3], 1 }

</bundles_post_ra>
